<compile_context>
chip_gen: v7x
topology: tpu7x:2x2x1
jax: 0.10.0
libtpu: 0.0.40
codegen_flags: <defaults>
</compile_context>

<pallas_src>
import functools

import jax
import jax.numpy as jnp
from jax import lax
from jax.experimental import pallas as pl
from jax.experimental.pallas import tpu as pltpu


# ----------------------------------------------------------------------------
# helpers
# ----------------------------------------------------------------------------
def _round_up(x, m):
    return ((x + m - 1) // m) * m


def _cdiv(a, b):
    return -(-a // b)


def _device_kind():
    try:
        return jax.devices()[0].device_kind.lower().replace(" ", "")
    except Exception:
        return ""


def _is_v7x():
    k = _device_kind()
    return ("v7" in k) or ("7x" in k)


def _vmem_capacity_bytes():
    """Physical VMEM per TensorCore, with safe fallbacks."""
    try:
        info = pltpu.get_tpu_info()
        cap = getattr(info, "vmem_capacity_bytes", None)
        if cap:
            return int(cap)
    except Exception:
        pass
    return (64 if _is_v7x() else 128) * (1 << 20)


# ----------------------------------------------------------------------------
# kernel
# ----------------------------------------------------------------------------
def _make_lstm_kernel(T, Tb, Hp, needs_mask, unroll):
    """Build the kernel body (T, Tb, Hp, needs_mask, unroll are static)."""

    def kernel(xg_ref, whh_hbm, h0_ref, c0_ref, hseq_ref, cf_ref,
               w_scr, h_scr, c_scr, dma_sem):
        # xg_ref  : (Tb, Bb, 4*Hp) bf16  pre-projected input gates (+bias)
        # whh_hbm : (Hp, 4*Hp)     bf16  recurrent weight, raw HBM ref
        # h0/c0   : (Bb, Hp)       f32   initial state for this batch block
        # hseq_ref: (Tb, Bb, Hp)   f32   hidden outputs for this block
        # cf_ref  : (Bb, Hp)       f32   final cell state for this batch block
        # w_scr   : (Hp, 4*Hp)     bf16  resident W_hh^T (single buffer)
        # h_scr/c_scr : (Bb, Hp)   f32   recurrence carry across time blocks
        tb = pl.program_id(1)
        n_tb = pl.num_programs(1)

        @pl.when(tb == 0)
        def _():
            # Load the constant recurrent weight once per batch block into a
            # single VMEM scratch buffer (no pointless double buffering), and
            # initialize the carried state.
            cp = pltpu.make_async_copy(whh_hbm, w_scr, dma_sem)
            cp.start()
            h_scr[...] = h0_ref[...]
            c_scr[...] = c0_ref[...]
            cp.wait()

        def step(t, carry):
            h, c = carry
            # Only the recurrent projection runs inside the serial loop.
            gates = xg_ref[t].astype(jnp.float32) + jnp.dot(
                h.astype(jnp.bfloat16), w_scr[...],
                preferred_element_type=jnp.float32)
            # torch.nn.LSTM gate order: i, f, g, o.  Hp is a multiple of 128
            # so every gate slice is lane-aligned (no cross-lane relayout).
            i_g = jax.nn.sigmoid(gates[:, 0 * Hp:1 * Hp])
            f_g = jax.nn.sigmoid(gates[:, 1 * Hp:2 * Hp])
            g_g = jnp.tanh(gates[:, 2 * Hp:3 * Hp])
            o_g = jax.nn.sigmoid(gates[:, 3 * Hp:4 * Hp])
            c_new = f_g * c + i_g * g_g
            h_new = o_g * jnp.tanh(c_new)
            hseq_ref[t] = h_new                    # lane-dense (Bb, Hp) store
            if needs_mask:
                # Padded tail steps must not advance the carried state
                # (zero gates are NOT inert: 0 + h@W still mutates h/c).
                valid = (tb * Tb + t) < T
                h_new = jnp.where(valid, h_new, h)
                c_new = jnp.where(valid, c_new, c)
            return (h_new, c_new)

        h, c = lax.fori_loop(0, Tb, step, (h_scr[...], c_scr[...]),
                             unroll=unroll)

        # Carry the state to the next time block.
        h_scr[...] = h
        c_scr[...] = c

        @pl.when(tb == n_tb - 1)
        def _():
            cf_ref[...] = c

    return kernel


# ----------------------------------------------------------------------------
# pure-JAX fallback / reference
# ----------------------------------------------------------------------------
def _lstm_scan(x, w_ih, w_hh, b_ih, b_hh, h0, c0):
    """Fused f32 lax.scan path (also the correctness reference)."""
    H = w_hh.shape[1]

    def step(carry, x_t):
        h, c = carry
        gates = x_t @ w_ih.T + h @ w_hh.T + b_ih + b_hh
        i = jax.nn.sigmoid(gates[:, 0 * H:1 * H])
        f = jax.nn.sigmoid(gates[:, 1 * H:2 * H])
        g = jnp.tanh(gates[:, 2 * H:3 * H])
        o = jax.nn.sigmoid(gates[:, 3 * H:4 * H])
        c_new = f * c + i * g
        h_new = o * jnp.tanh(c_new)
        return (h_new, c_new), h_new

    (h_f, c_f), h_seq = lax.scan(step, (h0[0], c0[0]), x)
    return h_seq, h_f[None], c_f[None]


# ----------------------------------------------------------------------------
# wrapper
# ----------------------------------------------------------------------------
def lstm_forward(x, w_ih, w_hh, b_ih, b_hh, h0=None, c0=None,
                 *, max_time_block=32, use_pallas=None):
    """Single-layer LSTM forward (torch.nn.LSTM semantics).

    x: (T, B, I); w_ih: (4H, I); w_hh: (4H, H); b_*: (4H,); h0/c0: (1, B, H).
    Returns (h_seq, (h_final, c_final)).
    """
    f32 = jnp.float32
    bf16 = jnp.bfloat16

    x = jnp.asarray(x, f32)
    T, B, I = x.shape
    four_h = w_ih.shape[0]
    H = four_h // 4

    if h0 is None:
        h0 = jnp.zeros((1, B, H), f32)
    if c0 is None:
        c0 = jnp.zeros((1, B, H), f32)

    w_ih = jnp.asarray(w_ih, f32)
    w_hh = jnp.asarray(w_hh, f32)
    b_ih = jnp.asarray(b_ih, f32)
    b_hh = jnp.asarray(b_hh, f32)
    bias = b_ih + b_hh                                            # (4H,)

    # Small-H guard: per-gate padding to 128 lanes inflates DMA and matmul
    # width by Hp/H, so the Pallas path only pays off for H >= 128.
    if use_pallas is None:
        use_pallas = H >= 128
    if not use_pallas:
        h_seq, h_f, c_f = _lstm_scan(x, w_ih, w_hh, b_ih, b_hh,
                                     jnp.asarray(h0, f32), jnp.asarray(c0, f32))
        return h_seq, (h_f, c_f)

    # ---- padded, lane/sublane aligned sizes --------------------------------
    Hp = _round_up(H, 128)      # lane-aligned gate slices + lane-dense output
    Bp = _round_up(B, 8)        # fill sublanes / MXU rows
    # Split the padded batch into two blocks only when there are two
    # TensorCores to shard the "parallel" axis across (v7x); on v5e/v6e a
    # split is just extra grid-step overhead with a smaller matmul M.
    Bb = Bp // 2 if (_is_v7x() and Bp >= 16 and Bp % 16 == 0) else Bp

    # ---- time blocking derived from the chip's VMEM budget -----------------
    vmem_cap = _vmem_capacity_bytes()
    budget = vmem_cap - 8 * (1 << 20)          # leave headroom under physical

    def footprint(tb_):
        return (2 * tb_ * Bb * 4 * Hp * 2      # xgates bf16, double-buffered
                + 2 * tb_ * Bb * Hp * 4        # h_seq f32 out, double-buffered
                + Hp * 4 * Hp * 2              # W_hh^T bf16 scratch (single)
                + 8 * Bb * Hp * 4)             # h0/c0/c_final blocks + h/c scratch

    tb_cap = max(1, int(max_time_block))
    while tb_cap > 1 and footprint(tb_cap) > budget:
        tb_cap -= 1
    n_tblk = _cdiv(T, tb_cap)
    Tb = _cdiv(T, n_tblk)                      # balanced blocks, Tb <= tb_cap
    Tp = n_tblk * Tb
    needs_mask = Tp != T

    est = footprint(Tb)
    vmem_limit = int(min(budget, max(2 * est, 32 * (1 << 20))))

    # Bound the unroll factor by the per-step working set so large-Hp gate
    # tensors do not spill out of the vreg file.
    unroll = int(min(Tb, 8)) if Hp >= 512 else int(Tb)
    unroll = max(1, unroll)

    # ---- weights / bias pre-padded into the gate-column layout -------------
    # Gate k occupies columns [k*Hp, k*Hp + H); padded columns carry zero
    # weight & bias so padded hidden lanes stay exactly zero.
    w_ih_p = jnp.zeros((I, 4 * Hp), f32)
    bias_p = jnp.zeros((4 * Hp,), f32)
    whh_p = jnp.zeros((Hp, 4 * Hp), f32)
    for k in range(4):
        w_ih_p = w_ih_p.at[:, k * Hp:k * Hp + H].set(w_ih[k * H:(k + 1) * H, :].T)
        bias_p = bias_p.at[k * Hp:k * Hp + H].set(bias[k * H:(k + 1) * H])
        whh_p = whh_p.at[:H, k * Hp:k * Hp + H].set(w_hh[k * H:(k + 1) * H, :].T)
    whh_p = whh_p.astype(bf16)                 # native MXU path, half the VMEM

    # ---- hoisted bf16 input projection, emitted directly in padded layout --
    # (padded batch rows see only the bias; they evolve independently and are
    #  sliced off at the end, so they never contaminate real rows.)
    x_p = jnp.zeros((T, Bp, I), f32).at[:, :B, :].set(x)
    xg = jnp.dot(x_p.reshape(T * Bp, I).astype(bf16), w_ih_p.astype(bf16),
                 preferred_element_type=f32) + bias_p
    xg_p = xg.reshape(T, Bp, 4 * Hp).astype(bf16)      # bf16 HBM/VMEM stream
    if needs_mask:
        xg_p = jnp.concatenate(
            [xg_p, jnp.zeros((Tp - T, Bp, 4 * Hp), bf16)], axis=0)

    h0_p = jnp.zeros((Bp, Hp), f32).at[:B, :H].set(jnp.asarray(h0, f32)[0])
    c0_p = jnp.zeros((Bp, Hp), f32).at[:B, :H].set(jnp.asarray(c0, f32)[0])

    grid = (Bp // Bb, Tp // Tb)

    grid_spec = pltpu.PrefetchScalarGridSpec(
        num_scalar_prefetch=0,
        grid=grid,
        in_specs=[
            pl.BlockSpec((Tb, Bb, 4 * Hp), lambda b, t: (t, b, 0)),  # xgates (bf16)
            pl.BlockSpec(memory_space=pl.ANY),                       # W_hh^T (HBM)
            pl.BlockSpec((Bb, Hp), lambda b, t: (b, 0)),             # h0
            pl.BlockSpec((Bb, Hp), lambda b, t: (b, 0)),             # c0
        ],
        out_specs=[
            pl.BlockSpec((Tb, Bb, Hp), lambda b, t: (t, b, 0)),      # h_seq
            pl.BlockSpec((Bb, Hp), lambda b, t: (b, 0)),             # c_final
        ],
        scratch_shapes=[
            pltpu.VMEM((Hp, 4 * Hp), bf16),   # resident W_hh^T (single buffer)
            pltpu.VMEM((Bb, Hp), f32),        # carried h
            pltpu.VMEM((Bb, Hp), f32),        # carried c
            pltpu.SemaphoreType.DMA(()),      # weight-load semaphore
        ],
    )

    kernel = _make_lstm_kernel(T, Tb, Hp, needs_mask, unroll)

    # TODO(synk): if xprof on v7x shows only one TensorCore busy, switch the
    # leading grid axis to CORE_PARALLEL semantics (or pl.core_map over
    # pltpu.create_tensorcore_mesh) to guarantee the 2-core batch split.
    h_seq_p, c_fin_p = pl.pallas_call(
        kernel,
        out_shape=(
            jax.ShapeDtypeStruct((Tp, Bp, Hp), f32),
            jax.ShapeDtypeStruct((Bp, Hp), f32),
        ),
        grid_spec=grid_spec,
        compiler_params=pltpu.CompilerParams(
            dimension_semantics=("parallel", "arbitrary"),  # batch ||, time serial
            vmem_limit_bytes=vmem_limit,
        ),
    )(xg_p, whh_p, h0_p, c0_p)

    h_seq = h_seq_p[:T, :B, :H]
    h_final = h_seq[-1:]                     # final hidden == last h_seq row
    c_final = c_fin_p[None, :B, :H]
    return h_seq, (h_final, c_final)


# ----------------------------------------------------------------------------
# test
# ----------------------------------------------------------------------------
if __name__ == "__main__":
    key = jax.random.PRNGKey(0)
    seq_len, batch, input_size, hidden_size = 8, 2, 4, 32

    k_x, k_wih, k_whh, k_bih, k_bhh, k_h, k_c = jax.random.split(key, 7)
    scale = 1.0 / (hidden_size ** 0.5)
    x = jax.random.normal(k_x, (seq_len, batch, input_size), jnp.float32)
    w_ih = jax.random.uniform(k_wih, (4 * hidden_size, input_size),
                              jnp.float32, -scale, scale)
    w_hh = jax.random.uniform(k_whh, (4 * hidden_size, hidden_size),
                              jnp.float32, -scale, scale)
    b_ih = jax.random.uniform(k_bih, (4 * hidden_size,), jnp.float32, -scale, scale)
    b_hh = jax.random.uniform(k_bhh, (4 * hidden_size,), jnp.float32, -scale, scale)
    h0 = jax.random.normal(k_h, (1, batch, hidden_size), jnp.float32)
    c0 = jax.random.normal(k_c, (1, batch, hidden_size), jnp.float32)

    # Pure-JAX f32 reference (torch.nn.LSTM semantics).
    r_seq, r_h, r_c = _lstm_scan(x, w_ih, w_hh, b_ih, b_hh, h0, c0)

    def check(fn, label):
        h_seq, (h_fin, c_fin) = fn(x, w_ih, w_hh, b_ih, b_hh, h0, c0)
        jax.block_until_ready((h_seq, h_fin, c_fin))
        assert h_seq.shape == (seq_len, batch, hidden_size), label
        assert h_fin.shape == (1, batch, hidden_size), label
        assert c_fin.shape == (1, batch, hidden_size), label
        # Tolerances account for bf16 gate slab / input projection / recurrent
        # matmul (f32 accumulation, f32 elementwise gate math).
        assert jnp.allclose(h_seq, r_seq, atol=5e-2, rtol=5e-2), f"{label}: h_seq"
        assert jnp.allclose(h_fin, r_h, atol=5e-2, rtol=5e-2), f"{label}: h_final"
        assert jnp.allclose(c_fin, r_c, atol=5e-2, rtol=5e-2), f"{label}: c_final"

    # 1) Pallas kernel, single time block (T divides evenly).
    check(jax.jit(functools.partial(lstm_forward, use_pallas=True)),
          "pallas(Tb=T)")
    # 2) Pallas kernel with a ragged/padded time axis (exercises the mask).
    check(jax.jit(functools.partial(lstm_forward, use_pallas=True,
                                    max_time_block=3)),
          "pallas(ragged T)")

    print("KERNEL_OK")
</pallas_src>

<mosaic_0001>
module attributes {stable_mosaic.version = 11 : i64} {
  func.func @kernel(%arg0: i32, %arg1: i32, %arg2: memref<8x8x512xbf16, #tpu.memory_space<vmem>>, %arg3: memref<128x512xbf16, #tpu.memory_space<any>>, %arg4: memref<8x128xf32, #tpu.memory_space<vmem>>, %arg5: memref<8x128xf32, #tpu.memory_space<vmem>>, %arg6: memref<8x8x128xf32, #tpu.memory_space<vmem>>, %arg7: memref<8x128xf32, #tpu.memory_space<vmem>>, %arg8: memref<128x512xbf16, #tpu.memory_space<vmem>>, %arg9: memref<8x128xf32, #tpu.memory_space<vmem>>, %arg10: memref<8x128xf32, #tpu.memory_space<vmem>>, %arg11: memref<!tpu.dma_semaphore, #tpu.memory_space<semaphore_mem>>) attributes {dimension_semantics = [#tpu.dimension_semantics<parallel>, #tpu.dimension_semantics<arbitrary>], iteration_bounds = array<i64: 1, 1>, scalar_prefetch = 0 : i64, scratch_operands = 4 : i64, tpu.core_type = #tpu.core_type<tc>, window_params = [{transform_indices = @transform_0, window_bounds = array<i64: 8, 8, 512>}, {}, {transform_indices = @transform_2, window_bounds = array<i64: 8, 128>}, {transform_indices = @transform_3, window_bounds = array<i64: 8, 128>}, {transform_indices = @transform_4, window_bounds = array<i64: 8, 8, 128>}, {transform_indices = @transform_5, window_bounds = array<i64: 8, 128>}]} {
    %c0_i32 = arith.constant 0 : i32
    %0 = arith.cmpi eq, %arg1, %c0_i32 : i32
    %1 = arith.extui %0 : i1 to i32
    %c0_i32_0 = arith.constant 0 : i32
    %2 = arith.cmpi ne, %1, %c0_i32_0 : i32
    scf.if %2 {
      tpu.enqueue_dma source(%arg3 : memref<128x512xbf16, #tpu.memory_space<any>>) target(%arg8 : memref<128x512xbf16, #tpu.memory_space<vmem>>) target_semaphore(%arg11 : memref<!tpu.dma_semaphore, #tpu.memory_space<semaphore_mem>>)
      %c0_90 = arith.constant 0 : index
      %c0_91 = arith.constant 0 : index
      %306 = vector.load %arg4[%c0_90, %c0_91] : memref<8x128xf32, #tpu.memory_space<vmem>>, vector<8x128xf32>
      %c0_92 = arith.constant 0 : index
      %c0_93 = arith.constant 0 : index
      %307 = vector.load %arg9[%c0_92, %c0_93] : memref<8x128xf32, #tpu.memory_space<vmem>>, vector<8x128xf32>
      tpu.vector_store %arg9[%c0_92, %c0_93], %306 {strides = array<i32>} : memref<8x128xf32, #tpu.memory_space<vmem>>, vector<8x128xf32>,
      %c0_94 = arith.constant 0 : index
      %c0_95 = arith.constant 0 : index
      %308 = vector.load %arg5[%c0_94, %c0_95] : memref<8x128xf32, #tpu.memory_space<vmem>>, vector<8x128xf32>
      %c0_96 = arith.constant 0 : index
      %c0_97 = arith.constant 0 : index
      %309 = vector.load %arg10[%c0_96, %c0_97] : memref<8x128xf32, #tpu.memory_space<vmem>>, vector<8x128xf32>
      tpu.vector_store %arg10[%c0_96, %c0_97], %308 {strides = array<i32>} : memref<8x128xf32, #tpu.memory_space<vmem>>, vector<8x128xf32>,
      tpu.wait_dma2 semaphore(%arg11 : memref<!tpu.dma_semaphore, #tpu.memory_space<semaphore_mem>>) src(%arg3 : memref<128x512xbf16, #tpu.memory_space<any>>) dst(%arg8 : memref<128x512xbf16, #tpu.memory_space<vmem>>)
    } else {
    }
    %c0 = arith.constant 0 : index
    %c0_1 = arith.constant 0 : index
    %3 = vector.load %arg9[%c0, %c0_1] : memref<8x128xf32, #tpu.memory_space<vmem>>, vector<8x128xf32>
    %c0_2 = arith.constant 0 : index
    %c0_3 = arith.constant 0 : index
    %4 = vector.load %arg10[%c0_2, %c0_3] : memref<8x128xf32, #tpu.memory_space<vmem>>, vector<8x128xf32>
    %c0_i32_4 = arith.constant 0 : i32
    %5 = arith.index_cast %c0_i32_4 : i32 to index
    %c0_5 = arith.constant 0 : index
    %c0_6 = arith.constant 0 : index
    %6 = vector.load %arg2[%5, %c0_5, %c0_6] : memref<8x8x512xbf16, #tpu.memory_space<vmem>>, vector<1x8x512xbf16>
    %7 = vector.shape_cast %6 : vector<1x8x512xbf16> to vector<8x512xbf16>
    %8 = arith.extf %7 : vector<8x512xbf16> to vector<8x512xf32>
    %9 = arith.truncf %3 : vector<8x128xf32> to vector<8x128xbf16>
    %c0_7 = arith.constant 0 : index
    %c0_8 = arith.constant 0 : index
    %10 = vector.load %arg8[%c0_7, %c0_8] : memref<128x512xbf16, #tpu.memory_space<vmem>>, vector<128x512xbf16>
    %cst = arith.constant dense<0.000000e+00> : vector<8x512xf32>
    %11 = tpu.matmul %9, %10, %cst {dimension_numbers = #tpu.dot_dimension_numbers<[1], [0], [0], [1], [0, 0, 1, 1], [], []>} : vector<8x128xbf16>, vector<128x512xbf16>, vector<8x512xf32> -> vector<8x512xf32>
    %12 = arith.addf %8, %11 : vector<8x512xf32>
    %13 = vector.extract_strided_slice %12 {offsets = [0, 0], sizes = [8, 128], strides = [1, 1]} : vector<8x512xf32> to vector<8x128xf32>
    %14 = arith.negf %13 : vector<8x128xf32>
    %15 = math.exp %14 : vector<8x128xf32>
    %cst_9 = arith.constant 1.000000e+00 : f32
    %16 = vector.broadcast %cst_9 : f32 to vector<8x128xf32>
    %17 = arith.addf %16, %15 : vector<8x128xf32>
    %18 = arith.divf %16, %17 : vector<8x128xf32>
    %19 = vector.extract_strided_slice %12 {offsets = [0, 128], sizes = [8, 128], strides = [1, 1]} : vector<8x512xf32> to vector<8x128xf32>
    %20 = arith.negf %19 : vector<8x128xf32>
    %21 = math.exp %20 : vector<8x128xf32>
    %cst_10 = arith.constant 1.000000e+00 : f32
    %22 = vector.broadcast %cst_10 : f32 to vector<8x128xf32>
    %23 = arith.addf %22, %21 : vector<8x128xf32>
    %24 = arith.divf %22, %23 : vector<8x128xf32>
    %25 = vector.extract_strided_slice %12 {offsets = [0, 256], sizes = [8, 128], strides = [1, 1]} : vector<8x512xf32> to vector<8x128xf32>
    %26 = math.tanh %25 : vector<8x128xf32>
    %27 = vector.extract_strided_slice %12 {offsets = [0, 384], sizes = [8, 128], strides = [1, 1]} : vector<8x512xf32> to vector<8x128xf32>
    %28 = arith.negf %27 : vector<8x128xf32>
    %29 = math.exp %28 : vector<8x128xf32>
    %cst_11 = arith.constant 1.000000e+00 : f32
    %30 = vector.broadcast %cst_11 : f32 to vector<8x128xf32>
    %31 = arith.addf %30, %29 : vector<8x128xf32>
    %32 = arith.divf %30, %31 : vector<8x128xf32>
    %33 = arith.mulf %24, %4 : vector<8x128xf32>
    %34 = arith.mulf %18, %26 : vector<8x128xf32>
    %35 = arith.addf %33, %34 : vector<8x128xf32>
    %36 = math.tanh %35 : vector<8x128xf32>
    %37 = arith.mulf %32, %36 : vector<8x128xf32>
    %38 = arith.index_cast %c0_i32_4 : i32 to index
    %c0_12 = arith.constant 0 : index
    %c0_13 = arith.constant 0 : index
    %39 = vector.load %arg6[%38, %c0_12, %c0_13] : memref<8x8x128xf32, #tpu.memory_space<vmem>>, vector<1x8x128xf32>
    %40 = vector.shape_cast %39 : vector<1x8x128xf32> to vector<8x128xf32>
    %41 = vector.shape_cast %37 : vector<8x128xf32> to vector<1x8x128xf32>
    tpu.vector_store %arg6[%38, %c0_12, %c0_13], %41 {strides = array<i32>} : memref<8x8x128xf32, #tpu.memory_space<vmem>>, vector<1x8x128xf32>,
    %c1_i32 = arith.constant 1 : i32
    %42 = arith.index_cast %c1_i32 : i32 to index
    %c0_14 = arith.constant 0 : index
    %c0_15 = arith.constant 0 : index
    %43 = vector.load %arg2[%42, %c0_14, %c0_15] : memref<8x8x512xbf16, #tpu.memory_space<vmem>>, vector<1x8x512xbf16>
    %44 = vector.shape_cast %43 : vector<1x8x512xbf16> to vector<8x512xbf16>
    %45 = arith.extf %44 : vector<8x512xbf16> to vector<8x512xf32>
    %46 = arith.truncf %37 : vector<8x128xf32> to vector<8x128xbf16>
    %c0_16 = arith.constant 0 : index
    %c0_17 = arith.constant 0 : index
    %47 = vector.load %arg8[%c0_16, %c0_17] : memref<128x512xbf16, #tpu.memory_space<vmem>>, vector<128x512xbf16>
    %cst_18 = arith.constant dense<0.000000e+00> : vector<8x512xf32>
    %48 = tpu.matmul %46, %47, %cst_18 {dimension_numbers = #tpu.dot_dimension_numbers<[1], [0], [0], [1], [0, 0, 1, 1], [], []>} : vector<8x128xbf16>, vector<128x512xbf16>, vector<8x512xf32> -> vector<8x512xf32>
    %49 = arith.addf %45, %48 : vector<8x512xf32>
    %50 = vector.extract_strided_slice %49 {offsets = [0, 0], sizes = [8, 128], strides = [1, 1]} : vector<8x512xf32> to vector<8x128xf32>
    %51 = arith.negf %50 : vector<8x128xf32>
    %52 = math.exp %51 : vector<8x128xf32>
    %cst_19 = arith.constant 1.000000e+00 : f32
    %53 = vector.broadcast %cst_19 : f32 to vector<8x128xf32>
    %54 = arith.addf %53, %52 : vector<8x128xf32>
    %55 = arith.divf %53, %54 : vector<8x128xf32>
    %56 = vector.extract_strided_slice %49 {offsets = [0, 128], sizes = [8, 128], strides = [1, 1]} : vector<8x512xf32> to vector<8x128xf32>
    %57 = arith.negf %56 : vector<8x128xf32>
    %58 = math.exp %57 : vector<8x128xf32>
    %cst_20 = arith.constant 1.000000e+00 : f32
    %59 = vector.broadcast %cst_20 : f32 to vector<8x128xf32>
    %60 = arith.addf %59, %58 : vector<8x128xf32>
    %61 = arith.divf %59, %60 : vector<8x128xf32>
    %62 = vector.extract_strided_slice %49 {offsets = [0, 256], sizes = [8, 128], strides = [1, 1]} : vector<8x512xf32> to vector<8x128xf32>
    %63 = math.tanh %62 : vector<8x128xf32>
    %64 = vector.extract_strided_slice %49 {offsets = [0, 384], sizes = [8, 128], strides = [1, 1]} : vector<8x512xf32> to vector<8x128xf32>
    %65 = arith.negf %64 : vector<8x128xf32>
    %66 = math.exp %65 : vector<8x128xf32>
    %cst_21 = arith.constant 1.000000e+00 : f32
    %67 = vector.broadcast %cst_21 : f32 to vector<8x128xf32>
    %68 = arith.addf %67, %66 : vector<8x128xf32>
    %69 = arith.divf %67, %68 : vector<8x128xf32>
    %70 = arith.mulf %61, %35 : vector<8x128xf32>
    %71 = arith.mulf %55, %63 : vector<8x128xf32>
    %72 = arith.addf %70, %71 : vector<8x128xf32>
    %73 = math.tanh %72 : vector<8x128xf32>
    %74 = arith.mulf %69, %73 : vector<8x128xf32>
    %75 = arith.index_cast %c1_i32 : i32 to index
    %c0_22 = arith.constant 0 : index
    %c0_23 = arith.constant 0 : index
    %76 = vector.load %arg6[%75, %c0_22, %c0_23] : memref<8x8x128xf32, #tpu.memory_space<vmem>>, vector<1x8x128xf32>
    %77 = vector.shape_cast %76 : vector<1x8x128xf32> to vector<8x128xf32>
    %78 = vector.shape_cast %74 : vector<8x128xf32> to vector<1x8x128xf32>
    tpu.vector_store %arg6[%75, %c0_22, %c0_23], %78 {strides = array<i32>} : memref<8x8x128xf32, #tpu.memory_space<vmem>>, vector<1x8x128xf32>,
    %c2_i32 = arith.constant 2 : i32
    %79 = arith.index_cast %c2_i32 : i32 to index
    %c0_24 = arith.constant 0 : index
    %c0_25 = arith.constant 0 : index
    %80 = vector.load %arg2[%79, %c0_24, %c0_25] : memref<8x8x512xbf16, #tpu.memory_space<vmem>>, vector<1x8x512xbf16>
    %81 = vector.shape_cast %80 : vector<1x8x512xbf16> to vector<8x512xbf16>
    %82 = arith.extf %81 : vector<8x512xbf16> to vector<8x512xf32>
    %83 = arith.truncf %74 : vector<8x128xf32> to vector<8x128xbf16>
    %c0_26 = arith.constant 0 : index
    %c0_27 = arith.constant 0 : index
    %84 = vector.load %arg8[%c0_26, %c0_27] : memref<128x512xbf16, #tpu.memory_space<vmem>>, vector<128x512xbf16>
    %cst_28 = arith.constant dense<0.000000e+00> : vector<8x512xf32>
    %85 = tpu.matmul %83, %84, %cst_28 {dimension_numbers = #tpu.dot_dimension_numbers<[1], [0], [0], [1], [0, 0, 1, 1], [], []>} : vector<8x128xbf16>, vector<128x512xbf16>, vector<8x512xf32> -> vector<8x512xf32>
    %86 = arith.addf %82, %85 : vector<8x512xf32>
    %87 = vector.extract_strided_slice %86 {offsets = [0, 0], sizes = [8, 128], strides = [1, 1]} : vector<8x512xf32> to vector<8x128xf32>
    %88 = arith.negf %87 : vector<8x128xf32>
    %89 = math.exp %88 : vector<8x128xf32>
    %cst_29 = arith.constant 1.000000e+00 : f32
    %90 = vector.broadcast %cst_29 : f32 to vector<8x128xf32>
    %91 = arith.addf %90, %89 : vector<8x128xf32>
    %92 = arith.divf %90, %91 : vector<8x128xf32>
    %93 = vector.extract_strided_slice %86 {offsets = [0, 128], sizes = [8, 128], strides = [1, 1]} : vector<8x512xf32> to vector<8x128xf32>
    %94 = arith.negf %93 : vector<8x128xf32>
    %95 = math.exp %94 : vector<8x128xf32>
    %cst_30 = arith.constant 1.000000e+00 : f32
    %96 = vector.broadcast %cst_30 : f32 to vector<8x128xf32>
    %97 = arith.addf %96, %95 : vector<8x128xf32>
    %98 = arith.divf %96, %97 : vector<8x128xf32>
    %99 = vector.extract_strided_slice %86 {offsets = [0, 256], sizes = [8, 128], strides = [1, 1]} : vector<8x512xf32> to vector<8x128xf32>
    %100 = math.tanh %99 : vector<8x128xf32>
    %101 = vector.extract_strided_slice %86 {offsets = [0, 384], sizes = [8, 128], strides = [1, 1]} : vector<8x512xf32> to vector<8x128xf32>
    %102 = arith.negf %101 : vector<8x128xf32>
    %103 = math.exp %102 : vector<8x128xf32>
    %cst_31 = arith.constant 1.000000e+00 : f32
    %104 = vector.broadcast %cst_31 : f32 to vector<8x128xf32>
    %105 = arith.addf %104, %103 : vector<8x128xf32>
    %106 = arith.divf %104, %105 : vector<8x128xf32>
    %107 = arith.mulf %98, %72 : vector<8x128xf32>
    %108 = arith.mulf %92, %100 : vector<8x128xf32>
    %109 = arith.addf %107, %108 : vector<8x128xf32>
    %110 = math.tanh %109 : vector<8x128xf32>
    %111 = arith.mulf %106, %110 : vector<8x128xf32>
    %112 = arith.index_cast %c2_i32 : i32 to index
    %c0_32 = arith.constant 0 : index
    %c0_33 = arith.constant 0 : index
    %113 = vector.load %arg6[%112, %c0_32, %c0_33] : memref<8x8x128xf32, #tpu.memory_space<vmem>>, vector<1x8x128xf32>
    %114 = vector.shape_cast %113 : vector<1x8x128xf32> to vector<8x128xf32>
    %115 = vector.shape_cast %111 : vector<8x128xf32> to vector<1x8x128xf32>
    tpu.vector_store %arg6[%112, %c0_32, %c0_33], %115 {strides = array<i32>} : memref<8x8x128xf32, #tpu.memory_space<vmem>>, vector<1x8x128xf32>,
    %c3_i32 = arith.constant 3 : i32
    %116 = arith.index_cast %c3_i32 : i32 to index
    %c0_34 = arith.constant 0 : index
    %c0_35 = arith.constant 0 : index
    %117 = vector.load %arg2[%116, %c0_34, %c0_35] : memref<8x8x512xbf16, #tpu.memory_space<vmem>>, vector<1x8x512xbf16>
    %118 = vector.shape_cast %117 : vector<1x8x512xbf16> to vector<8x512xbf16>
    %119 = arith.extf %118 : vector<8x512xbf16> to vector<8x512xf32>
    %120 = arith.truncf %111 : vector<8x128xf32> to vector<8x128xbf16>
    %c0_36 = arith.constant 0 : index
    %c0_37 = arith.constant 0 : index
    %121 = vector.load %arg8[%c0_36, %c0_37] : memref<128x512xbf16, #tpu.memory_space<vmem>>, vector<128x512xbf16>
    %cst_38 = arith.constant dense<0.000000e+00> : vector<8x512xf32>
    %122 = tpu.matmul %120, %121, %cst_38 {dimension_numbers = #tpu.dot_dimension_numbers<[1], [0], [0], [1], [0, 0, 1, 1], [], []>} : vector<8x128xbf16>, vector<128x512xbf16>, vector<8x512xf32> -> vector<8x512xf32>
    %123 = arith.addf %119, %122 : vector<8x512xf32>
    %124 = vector.extract_strided_slice %123 {offsets = [0, 0], sizes = [8, 128], strides = [1, 1]} : vector<8x512xf32> to vector<8x128xf32>
    %125 = arith.negf %124 : vector<8x128xf32>
    %126 = math.exp %125 : vector<8x128xf32>
    %cst_39 = arith.constant 1.000000e+00 : f32
    %127 = vector.broadcast %cst_39 : f32 to vector<8x128xf32>
    %128 = arith.addf %127, %126 : vector<8x128xf32>
    %129 = arith.divf %127, %128 : vector<8x128xf32>
    %130 = vector.extract_strided_slice %123 {offsets = [0, 128], sizes = [8, 128], strides = [1, 1]} : vector<8x512xf32> to vector<8x128xf32>
    %131 = arith.negf %130 : vector<8x128xf32>
    %132 = math.exp %131 : vector<8x128xf32>
    %cst_40 = arith.constant 1.000000e+00 : f32
    %133 = vector.broadcast %cst_40 : f32 to vector<8x128xf32>
    %134 = arith.addf %133, %132 : vector<8x128xf32>
    %135 = arith.divf %133, %134 : vector<8x128xf32>
    %136 = vector.extract_strided_slice %123 {offsets = [0, 256], sizes = [8, 128], strides = [1, 1]} : vector<8x512xf32> to vector<8x128xf32>
    %137 = math.tanh %136 : vector<8x128xf32>
    %138 = vector.extract_strided_slice %123 {offsets = [0, 384], sizes = [8, 128], strides = [1, 1]} : vector<8x512xf32> to vector<8x128xf32>
    %139 = arith.negf %138 : vector<8x128xf32>
    %140 = math.exp %139 : vector<8x128xf32>
    %cst_41 = arith.constant 1.000000e+00 : f32
    %141 = vector.broadcast %cst_41 : f32 to vector<8x128xf32>
    %142 = arith.addf %141, %140 : vector<8x128xf32>
    %143 = arith.divf %141, %142 : vector<8x128xf32>
    %144 = arith.mulf %135, %109 : vector<8x128xf32>
    %145 = arith.mulf %129, %137 : vector<8x128xf32>
    %146 = arith.addf %144, %145 : vector<8x128xf32>
    %147 = math.tanh %146 : vector<8x128xf32>
    %148 = arith.mulf %143, %147 : vector<8x128xf32>
    %149 = arith.index_cast %c3_i32 : i32 to index
    %c0_42 = arith.constant 0 : index
    %c0_43 = arith.constant 0 : index
    %150 = vector.load %arg6[%149, %c0_42, %c0_43] : memref<8x8x128xf32, #tpu.memory_space<vmem>>, vector<1x8x128xf32>
    %151 = vector.shape_cast %150 : vector<1x8x128xf32> to vector<8x128xf32>
    %152 = vector.shape_cast %148 : vector<8x128xf32> to vector<1x8x128xf32>
    tpu.vector_store %arg6[%149, %c0_42, %c0_43], %152 {strides = array<i32>} : memref<8x8x128xf32, #tpu.memory_space<vmem>>, vector<1x8x128xf32>,
    %c4_i32 = arith.constant 4 : i32
    %153 = arith.index_cast %c4_i32 : i32 to index
    %c0_44 = arith.constant 0 : index
    %c0_45 = arith.constant 0 : index
    %154 = vector.load %arg2[%153, %c0_44, %c0_45] : memref<8x8x512xbf16, #tpu.memory_space<vmem>>, vector<1x8x512xbf16>
    %155 = vector.shape_cast %154 : vector<1x8x512xbf16> to vector<8x512xbf16>
    %156 = arith.extf %155 : vector<8x512xbf16> to vector<8x512xf32>
    %157 = arith.truncf %148 : vector<8x128xf32> to vector<8x128xbf16>
    %c0_46 = arith.constant 0 : index
    %c0_47 = arith.constant 0 : index
    %158 = vector.load %arg8[%c0_46, %c0_47] : memref<128x512xbf16, #tpu.memory_space<vmem>>, vector<128x512xbf16>
    %cst_48 = arith.constant dense<0.000000e+00> : vector<8x512xf32>
    %159 = tpu.matmul %157, %158, %cst_48 {dimension_numbers = #tpu.dot_dimension_numbers<[1], [0], [0], [1], [0, 0, 1, 1], [], []>} : vector<8x128xbf16>, vector<128x512xbf16>, vector<8x512xf32> -> vector<8x512xf32>
    %160 = arith.addf %156, %159 : vector<8x512xf32>
    %161 = vector.extract_strided_slice %160 {offsets = [0, 0], sizes = [8, 128], strides = [1, 1]} : vector<8x512xf32> to vector<8x128xf32>
    %162 = arith.negf %161 : vector<8x128xf32>
    %163 = math.exp %162 : vector<8x128xf32>
    %cst_49 = arith.constant 1.000000e+00 : f32
    %164 = vector.broadcast %cst_49 : f32 to vector<8x128xf32>
    %165 = arith.addf %164, %163 : vector<8x128xf32>
    %166 = arith.divf %164, %165 : vector<8x128xf32>
    %167 = vector.extract_strided_slice %160 {offsets = [0, 128], sizes = [8, 128], strides = [1, 1]} : vector<8x512xf32> to vector<8x128xf32>
    %168 = arith.negf %167 : vector<8x128xf32>
    %169 = math.exp %168 : vector<8x128xf32>
    %cst_50 = arith.constant 1.000000e+00 : f32
    %170 = vector.broadcast %cst_50 : f32 to vector<8x128xf32>
    %171 = arith.addf %170, %169 : vector<8x128xf32>
    %172 = arith.divf %170, %171 : vector<8x128xf32>
    %173 = vector.extract_strided_slice %160 {offsets = [0, 256], sizes = [8, 128], strides = [1, 1]} : vector<8x512xf32> to vector<8x128xf32>
    %174 = math.tanh %173 : vector<8x128xf32>
    %175 = vector.extract_strided_slice %160 {offsets = [0, 384], sizes = [8, 128], strides = [1, 1]} : vector<8x512xf32> to vector<8x128xf32>
    %176 = arith.negf %175 : vector<8x128xf32>
    %177 = math.exp %176 : vector<8x128xf32>
    %cst_51 = arith.constant 1.000000e+00 : f32
    %178 = vector.broadcast %cst_51 : f32 to vector<8x128xf32>
    %179 = arith.addf %178, %177 : vector<8x128xf32>
    %180 = arith.divf %178, %179 : vector<8x128xf32>
    %181 = arith.mulf %172, %146 : vector<8x128xf32>
    %182 = arith.mulf %166, %174 : vector<8x128xf32>
    %183 = arith.addf %181, %182 : vector<8x128xf32>
    %184 = math.tanh %183 : vector<8x128xf32>
    %185 = arith.mulf %180, %184 : vector<8x128xf32>
    %186 = arith.index_cast %c4_i32 : i32 to index
    %c0_52 = arith.constant 0 : index
    %c0_53 = arith.constant 0 : index
    %187 = vector.load %arg6[%186, %c0_52, %c0_53] : memref<8x8x128xf32, #tpu.memory_space<vmem>>, vector<1x8x128xf32>
    %188 = vector.shape_cast %187 : vector<1x8x128xf32> to vector<8x128xf32>
    %189 = vector.shape_cast %185 : vector<8x128xf32> to vector<1x8x128xf32>
    tpu.vector_store %arg6[%186, %c0_52, %c0_53], %189 {strides = array<i32>} : memref<8x8x128xf32, #tpu.memory_space<vmem>>, vector<1x8x128xf32>,
    %c5_i32 = arith.constant 5 : i32
    %190 = arith.index_cast %c5_i32 : i32 to index
    %c0_54 = arith.constant 0 : index
    %c0_55 = arith.constant 0 : index
    %191 = vector.load %arg2[%190, %c0_54, %c0_55] : memref<8x8x512xbf16, #tpu.memory_space<vmem>>, vector<1x8x512xbf16>
    %192 = vector.shape_cast %191 : vector<1x8x512xbf16> to vector<8x512xbf16>
    %193 = arith.extf %192 : vector<8x512xbf16> to vector<8x512xf32>
    %194 = arith.truncf %185 : vector<8x128xf32> to vector<8x128xbf16>
    %c0_56 = arith.constant 0 : index
    %c0_57 = arith.constant 0 : index
    %195 = vector.load %arg8[%c0_56, %c0_57] : memref<128x512xbf16, #tpu.memory_space<vmem>>, vector<128x512xbf16>
    %cst_58 = arith.constant dense<0.000000e+00> : vector<8x512xf32>
    %196 = tpu.matmul %194, %195, %cst_58 {dimension_numbers = #tpu.dot_dimension_numbers<[1], [0], [0], [1], [0, 0, 1, 1], [], []>} : vector<8x128xbf16>, vector<128x512xbf16>, vector<8x512xf32> -> vector<8x512xf32>
    %197 = arith.addf %193, %196 : vector<8x512xf32>
    %198 = vector.extract_strided_slice %197 {offsets = [0, 0], sizes = [8, 128], strides = [1, 1]} : vector<8x512xf32> to vector<8x128xf32>
    %199 = arith.negf %198 : vector<8x128xf32>
    %200 = math.exp %199 : vector<8x128xf32>
    %cst_59 = arith.constant 1.000000e+00 : f32
    %201 = vector.broadcast %cst_59 : f32 to vector<8x128xf32>
    %202 = arith.addf %201, %200 : vector<8x128xf32>
    %203 = arith.divf %201, %202 : vector<8x128xf32>
    %204 = vector.extract_strided_slice %197 {offsets = [0, 128], sizes = [8, 128], strides = [1, 1]} : vector<8x512xf32> to vector<8x128xf32>
    %205 = arith.negf %204 : vector<8x128xf32>
    %206 = math.exp %205 : vector<8x128xf32>
    %cst_60 = arith.constant 1.000000e+00 : f32
    %207 = vector.broadcast %cst_60 : f32 to vector<8x128xf32>
    %208 = arith.addf %207, %206 : vector<8x128xf32>
    %209 = arith.divf %207, %208 : vector<8x128xf32>
    %210 = vector.extract_strided_slice %197 {offsets = [0, 256], sizes = [8, 128], strides = [1, 1]} : vector<8x512xf32> to vector<8x128xf32>
    %211 = math.tanh %210 : vector<8x128xf32>
    %212 = vector.extract_strided_slice %197 {offsets = [0, 384], sizes = [8, 128], strides = [1, 1]} : vector<8x512xf32> to vector<8x128xf32>
    %213 = arith.negf %212 : vector<8x128xf32>
    %214 = math.exp %213 : vector<8x128xf32>
    %cst_61 = arith.constant 1.000000e+00 : f32
    %215 = vector.broadcast %cst_61 : f32 to vector<8x128xf32>
    %216 = arith.addf %215, %214 : vector<8x128xf32>
    %217 = arith.divf %215, %216 : vector<8x128xf32>
    %218 = arith.mulf %209, %183 : vector<8x128xf32>
    %219 = arith.mulf %203, %211 : vector<8x128xf32>
    %220 = arith.addf %218, %219 : vector<8x128xf32>
    %221 = math.tanh %220 : vector<8x128xf32>
    %222 = arith.mulf %217, %221 : vector<8x128xf32>
    %223 = arith.index_cast %c5_i32 : i32 to index
    %c0_62 = arith.constant 0 : index
    %c0_63 = arith.constant 0 : index
    %224 = vector.load %arg6[%223, %c0_62, %c0_63] : memref<8x8x128xf32, #tpu.memory_space<vmem>>, vector<1x8x128xf32>
    %225 = vector.shape_cast %224 : vector<1x8x128xf32> to vector<8x128xf32>
    %226 = vector.shape_cast %222 : vector<8x128xf32> to vector<1x8x128xf32>
    tpu.vector_store %arg6[%223, %c0_62, %c0_63], %226 {strides = array<i32>} : memref<8x8x128xf32, #tpu.memory_space<vmem>>, vector<1x8x128xf32>,
    %c6_i32 = arith.constant 6 : i32
    %227 = arith.index_cast %c6_i32 : i32 to index
    %c0_64 = arith.constant 0 : index
    %c0_65 = arith.constant 0 : index
    %228 = vector.load %arg2[%227, %c0_64, %c0_65] : memref<8x8x512xbf16, #tpu.memory_space<vmem>>, vector<1x8x512xbf16>
    %229 = vector.shape_cast %228 : vector<1x8x512xbf16> to vector<8x512xbf16>
    %230 = arith.extf %229 : vector<8x512xbf16> to vector<8x512xf32>
    %231 = arith.truncf %222 : vector<8x128xf32> to vector<8x128xbf16>
    %c0_66 = arith.constant 0 : index
    %c0_67 = arith.constant 0 : index
    %232 = vector.load %arg8[%c0_66, %c0_67] : memref<128x512xbf16, #tpu.memory_space<vmem>>, vector<128x512xbf16>
    %cst_68 = arith.constant dense<0.000000e+00> : vector<8x512xf32>
    %233 = tpu.matmul %231, %232, %cst_68 {dimension_numbers = #tpu.dot_dimension_numbers<[1], [0], [0], [1], [0, 0, 1, 1], [], []>} : vector<8x128xbf16>, vector<128x512xbf16>, vector<8x512xf32> -> vector<8x512xf32>
    %234 = arith.addf %230, %233 : vector<8x512xf32>
    %235 = vector.extract_strided_slice %234 {offsets = [0, 0], sizes = [8, 128], strides = [1, 1]} : vector<8x512xf32> to vector<8x128xf32>
    %236 = arith.negf %235 : vector<8x128xf32>
    %237 = math.exp %236 : vector<8x128xf32>
    %cst_69 = arith.constant 1.000000e+00 : f32
    %238 = vector.broadcast %cst_69 : f32 to vector<8x128xf32>
    %239 = arith.addf %238, %237 : vector<8x128xf32>
    %240 = arith.divf %238, %239 : vector<8x128xf32>
    %241 = vector.extract_strided_slice %234 {offsets = [0, 128], sizes = [8, 128], strides = [1, 1]} : vector<8x512xf32> to vector<8x128xf32>
    %242 = arith.negf %241 : vector<8x128xf32>
    %243 = math.exp %242 : vector<8x128xf32>
    %cst_70 = arith.constant 1.000000e+00 : f32
    %244 = vector.broadcast %cst_70 : f32 to vector<8x128xf32>
    %245 = arith.addf %244, %243 : vector<8x128xf32>
    %246 = arith.divf %244, %245 : vector<8x128xf32>
    %247 = vector.extract_strided_slice %234 {offsets = [0, 256], sizes = [8, 128], strides = [1, 1]} : vector<8x512xf32> to vector<8x128xf32>
    %248 = math.tanh %247 : vector<8x128xf32>
    %249 = vector.extract_strided_slice %234 {offsets = [0, 384], sizes = [8, 128], strides = [1, 1]} : vector<8x512xf32> to vector<8x128xf32>
    %250 = arith.negf %249 : vector<8x128xf32>
    %251 = math.exp %250 : vector<8x128xf32>
    %cst_71 = arith.constant 1.000000e+00 : f32
    %252 = vector.broadcast %cst_71 : f32 to vector<8x128xf32>
    %253 = arith.addf %252, %251 : vector<8x128xf32>
    %254 = arith.divf %252, %253 : vector<8x128xf32>
    %255 = arith.mulf %246, %220 : vector<8x128xf32>
    %256 = arith.mulf %240, %248 : vector<8x128xf32>
    %257 = arith.addf %255, %256 : vector<8x128xf32>
    %258 = math.tanh %257 : vector<8x128xf32>
    %259 = arith.mulf %254, %258 : vector<8x128xf32>
    %260 = arith.index_cast %c6_i32 : i32 to index
    %c0_72 = arith.constant 0 : index
    %c0_73 = arith.constant 0 : index
    %261 = vector.load %arg6[%260, %c0_72, %c0_73] : memref<8x8x128xf32, #tpu.memory_space<vmem>>, vector<1x8x128xf32>
    %262 = vector.shape_cast %261 : vector<1x8x128xf32> to vector<8x128xf32>
    %263 = vector.shape_cast %259 : vector<8x128xf32> to vector<1x8x128xf32>
    tpu.vector_store %arg6[%260, %c0_72, %c0_73], %263 {strides = array<i32>} : memref<8x8x128xf32, #tpu.memory_space<vmem>>, vector<1x8x128xf32>,
    %c7_i32 = arith.constant 7 : i32
    %264 = arith.index_cast %c7_i32 : i32 to index
    %c0_74 = arith.constant 0 : index
    %c0_75 = arith.constant 0 : index
    %265 = vector.load %arg2[%264, %c0_74, %c0_75] : memref<8x8x512xbf16, #tpu.memory_space<vmem>>, vector<1x8x512xbf16>
    %266 = vector.shape_cast %265 : vector<1x8x512xbf16> to vector<8x512xbf16>
    %267 = arith.extf %266 : vector<8x512xbf16> to vector<8x512xf32>
    %268 = arith.truncf %259 : vector<8x128xf32> to vector<8x128xbf16>
    %c0_76 = arith.constant 0 : index
    %c0_77 = arith.constant 0 : index
    %269 = vector.load %arg8[%c0_76, %c0_77] : memref<128x512xbf16, #tpu.memory_space<vmem>>, vector<128x512xbf16>
    %cst_78 = arith.constant dense<0.000000e+00> : vector<8x512xf32>
    %270 = tpu.matmul %268, %269, %cst_78 {dimension_numbers = #tpu.dot_dimension_numbers<[1], [0], [0], [1], [0, 0, 1, 1], [], []>} : vector<8x128xbf16>, vector<128x512xbf16>, vector<8x512xf32> -> vector<8x512xf32>
    %271 = arith.addf %267, %270 : vector<8x512xf32>
    %272 = vector.extract_strided_slice %271 {offsets = [0, 0], sizes = [8, 128], strides = [1, 1]} : vector<8x512xf32> to vector<8x128xf32>
    %273 = arith.negf %272 : vector<8x128xf32>
    %274 = math.exp %273 : vector<8x128xf32>
    %cst_79 = arith.constant 1.000000e+00 : f32
    %275 = vector.broadcast %cst_79 : f32 to vector<8x128xf32>
    %276 = arith.addf %275, %274 : vector<8x128xf32>
    %277 = arith.divf %275, %276 : vector<8x128xf32>
    %278 = vector.extract_strided_slice %271 {offsets = [0, 128], sizes = [8, 128], strides = [1, 1]} : vector<8x512xf32> to vector<8x128xf32>
    %279 = arith.negf %278 : vector<8x128xf32>
    %280 = math.exp %279 : vector<8x128xf32>
    %cst_80 = arith.constant 1.000000e+00 : f32
    %281 = vector.broadcast %cst_80 : f32 to vector<8x128xf32>
    %282 = arith.addf %281, %280 : vector<8x128xf32>
    %283 = arith.divf %281, %282 : vector<8x128xf32>
    %284 = vector.extract_strided_slice %271 {offsets = [0, 256], sizes = [8, 128], strides = [1, 1]} : vector<8x512xf32> to vector<8x128xf32>
    %285 = math.tanh %284 : vector<8x128xf32>
    %286 = vector.extract_strided_slice %271 {offsets = [0, 384], sizes = [8, 128], strides = [1, 1]} : vector<8x512xf32> to vector<8x128xf32>
    %287 = arith.negf %286 : vector<8x128xf32>
    %288 = math.exp %287 : vector<8x128xf32>
    %cst_81 = arith.constant 1.000000e+00 : f32
    %289 = vector.broadcast %cst_81 : f32 to vector<8x128xf32>
    %290 = arith.addf %289, %288 : vector<8x128xf32>
    %291 = arith.divf %289, %290 : vector<8x128xf32>
    %292 = arith.mulf %283, %257 : vector<8x128xf32>
    %293 = arith.mulf %277, %285 : vector<8x128xf32>
    %294 = arith.addf %292, %293 : vector<8x128xf32>
    %295 = math.tanh %294 : vector<8x128xf32>
    %296 = arith.mulf %291, %295 : vector<8x128xf32>
    %297 = arith.index_cast %c7_i32 : i32 to index
    %c0_82 = arith.constant 0 : index
    %c0_83 = arith.constant 0 : index
    %298 = vector.load %arg6[%297, %c0_82, %c0_83] : memref<8x8x128xf32, #tpu.memory_space<vmem>>, vector<1x8x128xf32>
    %299 = vector.shape_cast %298 : vector<1x8x128xf32> to vector<8x128xf32>
    %300 = vector.shape_cast %296 : vector<8x128xf32> to vector<1x8x128xf32>
    tpu.vector_store %arg6[%297, %c0_82, %c0_83], %300 {strides = array<i32>} : memref<8x8x128xf32, #tpu.memory_space<vmem>>, vector<1x8x128xf32>,
    %c8_i32 = arith.constant 8 : i32
    %c0_84 = arith.constant 0 : index
    %c0_85 = arith.constant 0 : index
    %301 = vector.load %arg9[%c0_84, %c0_85] : memref<8x128xf32, #tpu.memory_space<vmem>>, vector<8x128xf32>
    tpu.vector_store %arg9[%c0_84, %c0_85], %296 {strides = array<i32>} : memref<8x128xf32, #tpu.memory_space<vmem>>, vector<8x128xf32>,
    %c0_86 = arith.constant 0 : index
    %c0_87 = arith.constant 0 : index
    %302 = vector.load %arg10[%c0_86, %c0_87] : memref<8x128xf32, #tpu.memory_space<vmem>>, vector<8x128xf32>
    tpu.vector_store %arg10[%c0_86, %c0_87], %294 {strides = array<i32>} : memref<8x128xf32, #tpu.memory_space<vmem>>, vector<8x128xf32>,
    %c0_i32_88 = arith.constant 0 : i32
    %303 = arith.cmpi eq, %arg1, %c0_i32_88 : i32
    %304 = arith.extui %303 : i1 to i32
    %c0_i32_89 = arith.constant 0 : i32
    %305 = arith.cmpi ne, %304, %c0_i32_89 : i32
    scf.if %305 {
      %c0_90 = arith.constant 0 : index
      %c0_91 = arith.constant 0 : index
      %306 = vector.load %arg7[%c0_90, %c0_91] : memref<8x128xf32, #tpu.memory_space<vmem>>, vector<8x128xf32>
      tpu.vector_store %arg7[%c0_90, %c0_91], %294 {strides = array<i32>} : memref<8x128xf32, #tpu.memory_space<vmem>>, vector<8x128xf32>,
    } else {
    }
    return
  }
  func.func @transform_0(%arg0: i32, %arg1: i32) -> (i32, i32, i32) {
    %c0_i32 = arith.constant 0 : i32
    %c0_i32_0 = arith.constant 0 : i32
    return %arg1, %arg0, %c0_i32 : i32, i32, i32
  }
  func.func @transform_2(%arg0: i32, %arg1: i32) -> (i32, i32) {
    %c0_i32 = arith.constant 0 : i32
    %c0_i32_0 = arith.constant 0 : i32
    return %arg0, %c0_i32 : i32, i32
  }
  func.func @transform_3(%arg0: i32, %arg1: i32) -> (i32, i32) {
    %c0_i32 = arith.constant 0 : i32
    %c0_i32_0 = arith.constant 0 : i32
    return %arg0, %c0_i32 : i32, i32
  }
  func.func @transform_4(%arg0: i32, %arg1: i32) -> (i32, i32, i32) {
    %c0_i32 = arith.constant 0 : i32
    %c0_i32_0 = arith.constant 0 : i32
    return %arg1, %arg0, %c0_i32 : i32, i32, i32
  }
  func.func @transform_5(%arg0: i32, %arg1: i32) -> (i32, i32) {
    %c0_i32 = arith.constant 0 : i32
    %c0_i32_0 = arith.constant 0 : i32
    return %arg0, %c0_i32 : i32, i32
  }
}

</mosaic_0001>

<bundles_post_ra>
// kernel: lstm_forward.1
= control target key start
LH: loop header
LB: loop body
LE: loop exit
PB: predicated region body
PF: predicated region fallthrough
CT: control target
= control target key end

     0   :  { %s2475_s0 = inlined_call_operand.vmem [shape: bf16[8,8,512], index: 0, kind: input, shape index: {}]   ;;  %s2476_s1 = inlined_call_operand.vmem [shape: bf16[128,512], index: 1, kind: input, shape index: {}]   ;;  %s2477_s2 = inlined_call_operand.vmem [shape: f32[8,128], index: 2, kind: input, shape index: {}]   ;;  %s2478_s3 = inlined_call_operand.vmem [shape: f32[8,128], index: 3, kind: input, shape index: {}]   ;;  %s2479_s4 = inlined_call_operand.vmem [shape: f32[8,8,128], index: 4, kind: output, shape index: {0}]   ;;  %s2480_s5 = inlined_call_operand.vmem [shape: f32[8,128], index: 5, kind: output, shape index: {1}]  }
   0x1   :  { %v39_v0 = vld [vmem:[%s2476_s1] sm:$0xf]  ;;  %v41_v1 = vld [vmem:[%s2476_s1 + $0x10] sm:$0xf]  ;;  %v43_v2 = vld [vmem:[%s2476_s1 + $0x4] sm:$0xf] }
   0x2   :  { %40 = vst [vmem:[#allocation2] sm:$0xf] %v39_v0  ;;  %42 = vst [vmem:[#allocation2 + $0x4] sm:$0xf] %v41_v1  ;;  %v45_v3 = vld [vmem:[%s2476_s1 + $0x14] sm:$0xf] }
   0x3   :  { %44 = vst [vmem:[#allocation2 + $0x8] sm:$0xf] %v43_v2  ;;  %v47_v4 = vld [vmem:[%s2476_s1 + $0x8] sm:$0xf]  ;;  %v49_v5 = vld [vmem:[%s2476_s1 + $0x18] sm:$0xf] }
   0x4   :  { %46 = vst [vmem:[#allocation2 + $0xc] sm:$0xf] %v45_v3  ;;  %48 = vst [vmem:[#allocation2 + $0x10] sm:$0xf] %v47_v4  ;;  %v51_v6 = vld [vmem:[%s2476_s1 + $0xc] sm:$0xf] }
   0x5   :  { %50 = vst [vmem:[#allocation2 + $0x14] sm:$0xf] %v49_v5  ;;  %v53_v7 = vld [vmem:[%s2476_s1 + $0x1c] sm:$0xff]   ;;  %v57_v8 = vld [vmem:[%s2476_s1 + $0x30] sm:$0xf] }
   0x6   :  { %52 = vst [vmem:[#allocation2 + $0x18] sm:$0xf] %v51_v6  ;;  %54 = vst [vmem:[#allocation2 + $0x1c] sm:$0xff] %v53_v7   ;;  %v59_v9 = vld [vmem:[%s2476_s1 + $0x24] sm:$0xf]  ;;  %v69_v14 = vld [vmem:[%s2476_s1 + $0x3c] sm:$0xff]  }
   0x7   :  { %58 = vst [vmem:[#allocation2 + $0x24] sm:$0xf] %v57_v8  ;;  %v61_v10 = vld [vmem:[%s2476_s1 + $0x34] sm:$0xf]  ;;  %v63_v11 = vld [vmem:[%s2476_s1 + $0x28] sm:$0xf] }
   0x8   :  { %60 = vst [vmem:[#allocation2 + $0x28] sm:$0xf] %v59_v9  ;;  %62 = vst [vmem:[#allocation2 + $0x2c] sm:$0xf] %v61_v10  ;;  %v65_v12 = vld [vmem:[%s2476_s1 + $0x38] sm:$0xf] }
   0x9   :  { %64 = vst [vmem:[#allocation2 + $0x30] sm:$0xf] %v63_v11  ;;  %v67_v13 = vld [vmem:[%s2476_s1 + $0x2c] sm:$0xf]  ;;  %66 = vst [vmem:[#allocation2 + $0x34] sm:$0xf] %v65_v12 }
   0xa   :  { %68 = vst [vmem:[#allocation2 + $0x38] sm:$0xf] %v67_v13  ;;  %70 = vst [vmem:[#allocation2 + $0x3c] sm:$0xff] %v69_v14   ;;  %v73_v15 = vld [vmem:[%s2476_s1 + $0x50] sm:$0xf]  ;;  %v85_v21 = vld [vmem:[%s2476_s1 + $0x5c] sm:$0xff]  }
   0xb   :  { %v75_v16 = vld [vmem:[%s2476_s1 + $0x44] sm:$0xf]  ;;  %v77_v17 = vld [vmem:[%s2476_s1 + $0x54] sm:$0xf]  ;;  %74 = vst [vmem:[#allocation2 + $0x44] sm:$0xf] %v73_v15 }
   0xc   :  { %76 = vst [vmem:[#allocation2 + $0x48] sm:$0xf] %v75_v16  ;;  %78 = vst [vmem:[#allocation2 + $0x4c] sm:$0xf] %v77_v17  ;;  %v79_v18 = vld [vmem:[%s2476_s1 + $0x48] sm:$0xf] }
   0xd   :  { %v81_v19 = vld [vmem:[%s2476_s1 + $0x58] sm:$0xf]  ;;  %v83_v20 = vld [vmem:[%s2476_s1 + $0x4c] sm:$0xf]  ;;  %80 = vst [vmem:[#allocation2 + $0x50] sm:$0xf] %v79_v18 }
   0xe   :  { %82 = vst [vmem:[#allocation2 + $0x54] sm:$0xf] %v81_v19  ;;  %84 = vst [vmem:[#allocation2 + $0x58] sm:$0xf] %v83_v20  ;;  %v89_v22 = vld [vmem:[%s2476_s1 + $0x70] sm:$0xf] }
   0xf   :  { %v91_v23 = vld [vmem:[%s2476_s1 + $0x64] sm:$0xf]  ;;  %86 = vst [vmem:[#allocation2 + $0x5c] sm:$0xff] %v85_v21   ;;  %90 = vst [vmem:[#allocation2 + $0x64] sm:$0xf] %v89_v22  ;;  %v101_v28 = vld [vmem:[%s2476_s1 + $0x7c] sm:$0xff]  }
  0x10   :  { %92 = vst [vmem:[#allocation2 + $0x68] sm:$0xf] %v91_v23  ;;  %v93_v24 = vld [vmem:[%s2476_s1 + $0x74] sm:$0xf]  ;;  %v95_v25 = vld [vmem:[%s2476_s1 + $0x68] sm:$0xf] }
  0x11   :  { %v97_v26 = vld [vmem:[%s2476_s1 + $0x78] sm:$0xf]  ;;  %94 = vst [vmem:[#allocation2 + $0x6c] sm:$0xf] %v93_v24  ;;  %96 = vst [vmem:[#allocation2 + $0x70] sm:$0xf] %v95_v25 }
  0x12   :  { %98 = vst [vmem:[#allocation2 + $0x74] sm:$0xf] %v97_v26  ;;  %v99_v27 = vld [vmem:[%s2476_s1 + $0x6c] sm:$0xf]  ;;  %v105_v29 = vld [vmem:[%s2476_s1 + $0x90] sm:$0xf] }
  0x13   :  { %100 = vst [vmem:[#allocation2 + $0x78] sm:$0xf] %v99_v27  ;;  %102 = vst [vmem:[#allocation2 + $0x7c] sm:$0xff] %v101_v28   ;;  %v107_v30 = vld [vmem:[%s2476_s1 + $0x84] sm:$0xf]  ;;  %v117_v35 = vld [vmem:[%s2476_s1 + $0x9c] sm:$0xff]  }
  0x14   :  { %106 = vst [vmem:[#allocation2 + $0x84] sm:$0xf] %v105_v29  ;;  %v109_v31 = vld [vmem:[%s2476_s1 + $0x94] sm:$0xf]  ;;  %v111_v32 = vld [vmem:[%s2476_s1 + $0x88] sm:$0xf] }
  0x15   :  { %108 = vst [vmem:[#allocation2 + $0x88] sm:$0xf] %v107_v30  ;;  %110 = vst [vmem:[#allocation2 + $0x8c] sm:$0xf] %v109_v31  ;;  %v113_v33 = vld [vmem:[%s2476_s1 + $0x98] sm:$0xf] }
  0x16   :  { %112 = vst [vmem:[#allocation2 + $0x90] sm:$0xf] %v111_v32  ;;  %v115_v34 = vld [vmem:[%s2476_s1 + $0x8c] sm:$0xf]  ;;  %114 = vst [vmem:[#allocation2 + $0x94] sm:$0xf] %v113_v33 }
  0x17   :  { %116 = vst [vmem:[#allocation2 + $0x98] sm:$0xf] %v115_v34  ;;  %118 = vst [vmem:[#allocation2 + $0x9c] sm:$0xff] %v117_v35   ;;  %v121_v36 = vld [vmem:[%s2476_s1 + $0xb0] sm:$0xf]  ;;  %v133_v42 = vld [vmem:[%s2476_s1 + $0xbc] sm:$0xff]  }
  0x18   :  { %v123_v37 = vld [vmem:[%s2476_s1 + $0xa4] sm:$0xf]  ;;  %v125_v38 = vld [vmem:[%s2476_s1 + $0xb4] sm:$0xf]  ;;  %122 = vst [vmem:[#allocation2 + $0xa4] sm:$0xf] %v121_v36 }
  0x19   :  { %124 = vst [vmem:[#allocation2 + $0xa8] sm:$0xf] %v123_v37  ;;  %126 = vst [vmem:[#allocation2 + $0xac] sm:$0xf] %v125_v38  ;;  %v127_v39 = vld [vmem:[%s2476_s1 + $0xa8] sm:$0xf] }
  0x1a   :  { %v129_v40 = vld [vmem:[%s2476_s1 + $0xb8] sm:$0xf]  ;;  %v131_v41 = vld [vmem:[%s2476_s1 + $0xac] sm:$0xf]  ;;  %128 = vst [vmem:[#allocation2 + $0xb0] sm:$0xf] %v127_v39 }
  0x1b   :  { %130 = vst [vmem:[#allocation2 + $0xb4] sm:$0xf] %v129_v40  ;;  %132 = vst [vmem:[#allocation2 + $0xb8] sm:$0xf] %v131_v41  ;;  %v137_v43 = vld [vmem:[%s2476_s1 + $0xd0] sm:$0xf] }
  0x1c   :  { %v139_v44 = vld [vmem:[%s2476_s1 + $0xc4] sm:$0xf]  ;;  %134 = vst [vmem:[#allocation2 + $0xbc] sm:$0xff] %v133_v42   ;;  %138 = vst [vmem:[#allocation2 + $0xc4] sm:$0xf] %v137_v43  ;;  %v149_v49 = vld [vmem:[%s2476_s1 + $0xdc] sm:$0xff]  }
  0x1d   :  { %140 = vst [vmem:[#allocation2 + $0xc8] sm:$0xf] %v139_v44  ;;  %v141_v45 = vld [vmem:[%s2476_s1 + $0xd4] sm:$0xf]  ;;  %v143_v46 = vld [vmem:[%s2476_s1 + $0xc8] sm:$0xf] }
  0x1e   :  { %v145_v47 = vld [vmem:[%s2476_s1 + $0xd8] sm:$0xf]  ;;  %142 = vst [vmem:[#allocation2 + $0xcc] sm:$0xf] %v141_v45  ;;  %144 = vst [vmem:[#allocation2 + $0xd0] sm:$0xf] %v143_v46 }
  0x1f   :  { %146 = vst [vmem:[#allocation2 + $0xd4] sm:$0xf] %v145_v47  ;;  %v147_v48 = vld [vmem:[%s2476_s1 + $0xcc] sm:$0xf]  ;;  %v153_v50 = vld [vmem:[%s2476_s1 + $0xf0] sm:$0xf] }
  0x20   :  { %148 = vst [vmem:[#allocation2 + $0xd8] sm:$0xf] %v147_v48  ;;  %150 = vst [vmem:[#allocation2 + $0xdc] sm:$0xff] %v149_v49   ;;  %v155_v51 = vld [vmem:[%s2476_s1 + $0xe4] sm:$0xf] }
  0x21   :  { %154 = vst [vmem:[#allocation2 + $0xe4] sm:$0xf] %v153_v50  ;;  %v157_v52 = vld [vmem:[%s2476_s1 + $0xf4] sm:$0xf]  ;;  %v159_v53 = vld [vmem:[%s2476_s1 + $0xe8] sm:$0xf] }
  0x22   :  { %156 = vst [vmem:[#allocation2 + $0xe8] sm:$0xf] %v155_v51  ;;  %158 = vst [vmem:[#allocation2 + $0xec] sm:$0xf] %v157_v52  ;;  %v161_v54 = vld [vmem:[%s2476_s1 + $0xf8] sm:$0xf] }
  0x23   :  { %160 = vst [vmem:[#allocation2 + $0xf0] sm:$0xf] %v159_v53  ;;  %v163_v55 = vld [vmem:[%s2476_s1 + $0xec] sm:$0xf]  ;;  %v165_v56 = vld [vmem:[%s2476_s1 + $0xfc] sm:$0xf] }
  0x24   :  { %162 = vst [vmem:[#allocation2 + $0xf4] sm:$0xf] %v161_v54  ;;  %164 = vst [vmem:[#allocation2 + $0xf8] sm:$0xf] %v163_v55 }
  0x25   :  { %166 = vst [vmem:[#allocation2 + $0xfc] sm:$0xf] %v165_v56 }
  0x26   :  { %325 = vsyncadd [#allocation5], 4096  ;;  %v1966_v57 = vld [vmem:[%s2477_s2] sm:$0xff] }
  0x27   :  { %v1971_v58 = vld [vmem:[%s2478_s3] sm:$0xff] }
  0x28   :  { %1759 = dma.done.wait [#allocation5], 4096 }
  0x29   :  { %1760 = vsyncadd [#allocation5], 4294963200  ;;  %v1761_v59 = vmov 0   ;;  %v1975_v60 = vld [vmem:[#allocation2 + $0x8] sm:$0xff]  ;;  %v1977_v61 = vld [vmem:[#allocation2] sm:$0xff]  ;;  %v342_v27 = vpack.c.bf16 %v1966_v57, %v1966_v57 }
  0x2a   :  { %407 = vmatprep.mubr.bf16.mxu0 %v1761_v59  ;;  %448 = vmatprep.mubr.bf16.mxu1 %v1761_v59  ;;  %v1979_v62 = vld [vmem:[#allocation2 + $0x28] sm:$0xff]  ;;  %v1983_v63 = vld [vmem:[#allocation2 + $0x18] sm:$0xff]  ;;  %v1986_v0 = vld [vmem:[#allocation2 + $0x20] sm:$0xff] }
  0x2b   :  { %375 = vmatprep.subr.bf16.mxu0 %v1975_v60  ;;  %416 = vmatprep.subr.bf16.mxu1 %v1983_v63  ;;  %v1989_v1 = vld [vmem:[#allocation2 + $0x10] sm:$0xff]  ;;  %v1991_v2 = vld [vmem:[#allocation2 + $0x38] sm:$0xff]  ;;  %v1993_v3 = vld [vmem:[#allocation2 + $0x48] sm:$0xff] }
  0x2c   :  { %376 = vmatpush1.bf16.msra.mxu0 %v1977_v61  ;;  %417 = vmatpush1.bf16.msra.mxu1 %v1989_v1  ;;  %v1997_v4 = vld [vmem:[#allocation2 + $0x30] sm:$0xff]  ;;  %v2000_v5 = vld [vmem:[#allocation2 + $0x58] sm:$0xff]  ;;  %v2003_v6 = vld [vmem:[#allocation2 + $0x40] sm:$0xff] }
  0x2d   :  { %377 = vmatprep.subr.bf16.mxu0 %v1979_v62  ;;  %418 = vmatprep.subr.bf16.mxu1 %v1991_v2  ;;  %v2005_v7 = vld [vmem:[#allocation2 + $0x68] sm:$0xff]  ;;  %v2009_v8 = vld [vmem:[#allocation2 + $0x50] sm:$0xff]  ;;  %v2012_v9 = vld [vmem:[#allocation2 + $0x78] sm:$0xff] }
  0x2e   :  { %v2015_v10 = vld [vmem:[#allocation2 + $0x60] sm:$0xff]  ;;  %v2017_v11 = vld [vmem:[#allocation2 + $0x88] sm:$0xff]  ;;  %v2021_v12 = vld [vmem:[#allocation2 + $0x70] sm:$0xff] }
  0x2f   :  { %v2024_v13 = vld [vmem:[#allocation2 + $0x98] sm:$0xff]  ;;  %v2027_v14 = vld [vmem:[#allocation2 + $0x80] sm:$0xff]  ;;  %v2029_v15 = vld [vmem:[#allocation2 + $0xa8] sm:$0xff] }
  0x30   :  { %378 = vmatpush1.bf16.msra.mxu0 %v1986_v0  ;;  %419 = vmatpush1.bf16.msra.mxu1 %v1997_v4  ;;  %v2033_v16 = vld [vmem:[#allocation2 + $0x90] sm:$0xff]  ;;  %v2036_v17 = vld [vmem:[#allocation2 + $0xb8] sm:$0xff]  ;;  %v2039_v18 = vld [vmem:[#allocation2 + $0xa0] sm:$0xff] }
  0x31   :  { %379 = vmatprep.subr.bf16.mxu0 %v1993_v3  ;;  %420 = vmatprep.subr.bf16.mxu1 %v2000_v5  ;;  %v2041_v19 = vld [vmem:[#allocation2 + $0xc8] sm:$0xff]  ;;  %v2045_v20 = vld [vmem:[#allocation2 + $0xb0] sm:$0xff]  ;;  %v2048_v21 = vld [vmem:[#allocation2 + $0xd8] sm:$0xff] }
  0x32   :  { %v2051_v22 = vld [vmem:[#allocation2 + $0xc0] sm:$0xff]  ;;  %v2053_v23 = vld [vmem:[#allocation2 + $0xe8] sm:$0xff]  ;;  %v2057_v24 = vld [vmem:[#allocation2 + $0xd0] sm:$0xff] }
  0x33   :  { %v2060_v25 = vld [vmem:[#allocation2 + $0xf8] sm:$0xff]  ;;  %v2063_v26 = vld [vmem:[#allocation2 + $0xe0] sm:$0xff]  ;;  %v2069_v28 = vld [vmem:[#allocation2 + $0xf0] sm:$0xff] }
  0x34   :  { %380 = vmatpush1.bf16.msra.mxu0 %v2003_v6  ;;  %421 = vmatpush1.bf16.msra.mxu1 %v2009_v8  ;;  %v336_v29 = vld [vmem:[%s2475_s0] sm:$0xff]  ;;  %v337_v33 = vld [vmem:[%s2475_s0 + $0x8] sm:$0xff] }
  0x35   :  { %381 = vmatprep.subr.bf16.mxu0 %v2005_v7  ;;  %422 = vmatprep.subr.bf16.mxu1 %v2012_v9  ;;  %v338_v30 = vunpack.c.l.bf16 %v336_v29  ;;  %v339_v31 = vunpack.c.h.bf16 %v336_v29  ;;  %v341_v41 = vunpack.c.h.bf16 %v337_v33  ;;  %v340_v47 = vunpack.c.l.bf16 %v337_v33 }
  0x38   :  { %382 = vmatpush1.bf16.msra.mxu0 %v2015_v10  ;;  %423 = vmatpush1.bf16.msra.mxu1 %v2021_v12 }
  0x39   :  { %383 = vmatprep.subr.bf16.mxu0 %v2017_v11  ;;  %424 = vmatprep.subr.bf16.mxu1 %v2024_v13 }
  0x3c   :  { %384 = vmatpush1.bf16.msra.mxu0 %v2027_v14  ;;  %425 = vmatpush1.bf16.msra.mxu1 %v2033_v16 }
  0x3d   :  { %385 = vmatprep.subr.bf16.mxu0 %v2029_v15  ;;  %426 = vmatprep.subr.bf16.mxu1 %v2036_v17 }
  0x40   :  { %386 = vmatpush1.bf16.msra.mxu0 %v2039_v18  ;;  %427 = vmatpush1.bf16.msra.mxu1 %v2045_v20 }
  0x41   :  { %387 = vmatprep.subr.bf16.mxu0 %v2041_v19  ;;  %428 = vmatprep.subr.bf16.mxu1 %v2048_v21 }
  0x44   :  { %388 = vmatpush1.bf16.msra.mxu0 %v2051_v22  ;;  %429 = vmatpush1.bf16.msra.mxu1 %v2057_v24 }
  0x45   :  { %389 = vmatprep.subr.bf16.mxu0 %v2053_v23  ;;  %430 = vmatprep.subr.bf16.mxu1 %v2060_v25 }
  0x48   :  { %390 = vmatpush1.bf16.msra.mxu0 %v2063_v26  ;;  %431 = vmatpush1.bf16.msra.mxu1 %v2069_v28 }
  0x49   :  { %526 = vmatprep.subr.bf16.mxu0 %v1975_v60  ;;  %567 = vmatprep.subr.bf16.mxu1 %v1983_v63 }
  0x4b   :  { %408 = vmatmul.mubr.bf16.vlgmr.msra.gmra.mrb[0].mxu0 %v342_v27  ;;  %449 = vmatmul.mubr.bf16.vlgmr.msra.gmra.mrb[0].mxu1 %v342_v27 }
  0x4c   :  { %527 = vmatpush1.bf16.msra.mxu0 %v1977_v61  ;;  %558 = vmatprep.mubr.bf16.mxu0 %v1761_v59 }
  0x4d   :  { %528 = vmatprep.subr.bf16.mxu0 %v1979_v62  ;;  %568 = vmatpush1.bf16.msra.mxu1 %v1989_v1 }
  0x4e   :  { %599 = vmatprep.mubr.bf16.mxu1 %v1761_v59  ;;  %569 = vmatprep.subr.bf16.mxu1 %v1991_v2 }
  0x50   :  { %529 = vmatpush1.bf16.msra.mxu0 %v1986_v0 }
  0x51   :  { %530 = vmatprep.subr.bf16.mxu0 %v1993_v3  ;;  %570 = vmatpush1.bf16.msra.mxu1 %v1997_v4 }
  0x52   :  { %571 = vmatprep.subr.bf16.mxu1 %v2000_v5 }
  0x54   :  { %531 = vmatpush1.bf16.msra.mxu0 %v2003_v6 }
  0x55   :  { %532 = vmatprep.subr.bf16.mxu0 %v2005_v7  ;;  %572 = vmatpush1.bf16.msra.mxu1 %v2009_v8 }
  0x56   :  { %573 = vmatprep.subr.bf16.mxu1 %v2012_v9 }
  0x58   :  { %533 = vmatpush1.bf16.msra.mxu0 %v2015_v10 }
  0x59   :  { %534 = vmatprep.subr.bf16.mxu0 %v2017_v11  ;;  %574 = vmatpush1.bf16.msra.mxu1 %v2021_v12 }
  0x5a   :  { %575 = vmatprep.subr.bf16.mxu1 %v2024_v13 }
  0x5c   :  { %535 = vmatpush1.bf16.msra.mxu0 %v2027_v14 }
  0x5d   :  { %536 = vmatprep.subr.bf16.mxu0 %v2029_v15  ;;  %576 = vmatpush1.bf16.msra.mxu1 %v2033_v16 }
  0x5e   :  { %577 = vmatprep.subr.bf16.mxu1 %v2036_v17 }
  0x60   :  { %537 = vmatpush1.bf16.msra.mxu0 %v2039_v18 }
  0x61   :  { %538 = vmatprep.subr.bf16.mxu0 %v2041_v19  ;;  %578 = vmatpush1.bf16.msra.mxu1 %v2045_v20 }
  0x62   :  { %579 = vmatprep.subr.bf16.mxu1 %v2048_v21 }
  0x64   :  { %539 = vmatpush1.bf16.msra.mxu0 %v2051_v22 }
  0x65   :  { %540 = vmatprep.subr.bf16.mxu0 %v2053_v23  ;;  %580 = vmatpush1.bf16.msra.mxu1 %v2057_v24 }
  0x66   :  { %581 = vmatprep.subr.bf16.mxu1 %v2060_v25 }
  0x68   :  { %541 = vmatpush1.bf16.msra.mxu0 %v2063_v26 }
  0x69   :  { %678 = vmatprep.subr.bf16.mxu0 %v1975_v60  ;;  %582 = vmatpush1.bf16.msra.mxu1 %v2069_v28 }
  0x6a   :  { %719 = vmatprep.subr.bf16.mxu1 %v1983_v63 }
 0x11e   :  { %v409_v32 = vpop.f32.mrb[0].mxu0  ;;  %v450_v38 = vpop.f32.mrb[0].mxu1 }
 0x11f   :  { %v457_v34 = vadd.f32 %v409_v32, %v338_v30  ;;  %v411_v35 = vpop.f32.mrb[1].mxu0  ;;  %v452_v42 = vpop.f32.mrb[1].mxu1  ;;  %v459_v49 = vadd.f32 %v450_v38, %v340_v47 }
 0x120   :  { %v458_v36 = vadd.f32 %v411_v35, %v339_v31  ;;  %v413_v37 = vpop.f32.mrb[2].mxu0  ;;  %v454_v44 = vpop.f32.mrb[2].mxu1  ;;  %v460_v46 = vadd.f32 %v452_v42, %v341_v41  ;;  %v1588_v41 = vld [vmem:[%s2475_s0 + $0x18] sm:$0xff] }
 0x121   :  { %v1584_v39 = vmul.f32 -1.442695, %v457_v34  ;;  %v414_v40 = vpop.f32.mrb[3].mxu0  ;;  %v455_v45 = vpop.f32.mrb[3].mxu1 }
 0x122   :  { %v1585_v43 = vmul.f32 -1.442695, %v458_v36  ;;  %v1586_v48 = vmul.f32 -1.442695, %v460_v46 }
 0x123   :  { %1631 = vpow2.f32 %v1584_v39 }
 0x124   :  { %1633 = vpow2.f32 %v1585_v43 }
 0x125   :  { %1635 = vpow2.f32 %v1586_v48 }
 0x126   :  { %1637 = vtanh.f32 %v459_v49 }
 0x12d   :  { %v1632_v50 = vpop.eup %1631 }
 0x12e   :  { %v1634_v51 = vpop.eup %1633  ;;  %v464_v52 = vadd.f32 1.0, %v1632_v50 }
 0x12f   :  { %v470_v53 = vadd.f32 1.0, %v1634_v51  ;;  %v1636_v54 = vpop.eup %1635  ;;  %v492_v51 = vunpack.c.h.bf16 %v1588_v41 }
 0x130   :  { %1639 = vrcp.f32 %v464_v52  ;;  %v1638_v55 = vpop.eup %1637  ;;  %v477_v57 = vadd.f32 1.0, %v1636_v54 }
 0x131   :  { %1641 = vrcp.f32 %v470_v53  ;;  %v491_v53 = vunpack.c.l.bf16 %v1588_v41 }
 0x132   :  { %1643 = vrcp.f32 %v477_v57 }
 0x13a   :  { %v1640_v56 = vpop.eup %1639 }
 0x13b   :  { %v1642_v27 = vpop.eup %1641  ;;  %v481_v29 = vmul.f32 %v1640_v56, %v1638_v55 }
 0x13c   :  { %v480_v30 = vmul.f32 %v1642_v27, %v1971_v58  ;;  %v1644_v32 = vpop.eup %1643  ;;  %v1587_v58 = vld [vmem:[%s2475_s0 + $0x10] sm:$0xff] }
 0x13d   :  { %v489_v36 = vunpack.c.l.bf16 %v1587_v58  ;;  %v490_v37 = vunpack.c.h.bf16 %v1587_v58 }
 0x13e   :  { %v2116_v31 = vadd.f32 %v481_v29, %v480_v30 }
 0x140   :  { %1645 = vtanh.f32 %v2116_v31 }
 0x14a   :  { %v1646_v33 = vpop.eup %1645 }
 0x14b   :  { %v484_v34 = vmul.f32 %v1646_v33, %v1644_v32 }
 0x14d   :  { %485 = vst [vmem:[%s2479_s4] sm:$0xff] %v484_v34  ;;  %v493_v35 = vpack.c.bf16 %v484_v34, %v484_v34 }
 0x14f   :  { %559 = vmatmul.mubr.bf16.vlgmr.msra.gmra.mrb[4].mxu0 %v493_v35  ;;  %600 = vmatmul.mubr.bf16.vlgmr.msra.gmra.mrb[4].mxu1 %v493_v35 }
 0x150   :  { %679 = vmatpush1.bf16.msra.mxu0 %v1977_v61  ;;  %720 = vmatpush1.bf16.msra.mxu1 %v1989_v1 }
 0x151   :  { %680 = vmatprep.subr.bf16.mxu0 %v1979_v62  ;;  %721 = vmatprep.subr.bf16.mxu1 %v1991_v2 }
 0x152   :  { %710 = vmatprep.mubr.bf16.mxu0 %v1761_v59  ;;  %751 = vmatprep.mubr.bf16.mxu1 %v1761_v59 }
 0x154   :  { %681 = vmatpush1.bf16.msra.mxu0 %v1986_v0  ;;  %722 = vmatpush1.bf16.msra.mxu1 %v1997_v4 }
 0x155   :  { %682 = vmatprep.subr.bf16.mxu0 %v1993_v3  ;;  %723 = vmatprep.subr.bf16.mxu1 %v2000_v5 }
 0x158   :  { %683 = vmatpush1.bf16.msra.mxu0 %v2003_v6  ;;  %724 = vmatpush1.bf16.msra.mxu1 %v2009_v8 }
 0x159   :  { %684 = vmatprep.subr.bf16.mxu0 %v2005_v7  ;;  %725 = vmatprep.subr.bf16.mxu1 %v2012_v9 }
 0x15c   :  { %685 = vmatpush1.bf16.msra.mxu0 %v2015_v10  ;;  %726 = vmatpush1.bf16.msra.mxu1 %v2021_v12 }
 0x15d   :  { %686 = vmatprep.subr.bf16.mxu0 %v2017_v11  ;;  %727 = vmatprep.subr.bf16.mxu1 %v2024_v13 }
 0x160   :  { %687 = vmatpush1.bf16.msra.mxu0 %v2027_v14  ;;  %728 = vmatpush1.bf16.msra.mxu1 %v2033_v16 }
 0x161   :  { %688 = vmatprep.subr.bf16.mxu0 %v2029_v15  ;;  %729 = vmatprep.subr.bf16.mxu1 %v2036_v17 }
 0x164   :  { %689 = vmatpush1.bf16.msra.mxu0 %v2039_v18  ;;  %730 = vmatpush1.bf16.msra.mxu1 %v2045_v20 }
 0x165   :  { %690 = vmatprep.subr.bf16.mxu0 %v2041_v19  ;;  %731 = vmatprep.subr.bf16.mxu1 %v2048_v21 }
 0x168   :  { %691 = vmatpush1.bf16.msra.mxu0 %v2051_v22  ;;  %732 = vmatpush1.bf16.msra.mxu1 %v2057_v24 }
 0x169   :  { %692 = vmatprep.subr.bf16.mxu0 %v2053_v23  ;;  %733 = vmatprep.subr.bf16.mxu1 %v2060_v25 }
 0x16c   :  { %693 = vmatpush1.bf16.msra.mxu0 %v2063_v26  ;;  %734 = vmatpush1.bf16.msra.mxu1 %v2069_v28 }
 0x16d   :  { %830 = vmatprep.subr.bf16.mxu0 %v1975_v60  ;;  %871 = vmatprep.subr.bf16.mxu1 %v1983_v63 }
 0x222   :  { %v560_v38 = vpop.f32.mrb[4].mxu0  ;;  %v601_v39 = vpop.f32.mrb[4].mxu1 }
 0x223   :  { %v608_v40 = vadd.f32 %v560_v38, %v489_v36  ;;  %v562_v42 = vpop.f32.mrb[5].mxu0  ;;  %v603_v43 = vpop.f32.mrb[5].mxu1  ;;  %v610_v55 = vadd.f32 %v601_v39, %v491_v53 }
 0x224   :  { %v609_v44 = vadd.f32 %v562_v42, %v490_v37  ;;  %v564_v45 = vpop.f32.mrb[6].mxu0  ;;  %v605_v46 = vpop.f32.mrb[6].mxu1  ;;  %v611_v52 = vadd.f32 %v603_v43, %v492_v51 }
 0x225   :  { %v1589_v47 = vmul.f32 -1.442695, %v608_v40  ;;  %v565_v48 = vpop.f32.mrb[7].mxu0  ;;  %v606_v49 = vpop.f32.mrb[7].mxu1 }
 0x226   :  { %v1590_v50 = vmul.f32 -1.442695, %v609_v44  ;;  %v1591_v54 = vmul.f32 -1.442695, %v611_v52 }
 0x227   :  { %1647 = vpow2.f32 %v1589_v47  ;;  %v1594_v47 = vld [vmem:[%s2475_s0 + $0x28] sm:$0xff] }
 0x228   :  { %1649 = vpow2.f32 %v1590_v50 }
 0x229   :  { %1651 = vpow2.f32 %v1591_v54 }
 0x22a   :  { %1653 = vtanh.f32 %v610_v55  ;;  %v644_v55 = vunpack.c.h.bf16 %v1594_v47 }
 0x231   :  { %v1648_v56 = vpop.eup %1647 }
 0x232   :  { %v1650_v57 = vpop.eup %1649  ;;  %v615_v27 = vadd.f32 1.0, %v1648_v56 }
 0x233   :  { %v621_v29 = vadd.f32 1.0, %v1650_v57  ;;  %v1652_v30 = vpop.eup %1651  ;;  %v643_v57 = vunpack.c.l.bf16 %v1594_v47 }
 0x234   :  { %1655 = vrcp.f32 %v615_v27  ;;  %v1654_v32 = vpop.eup %1653  ;;  %v628_v58 = vadd.f32 1.0, %v1652_v30 }
 0x235   :  { %1657 = vrcp.f32 %v621_v29 }
 0x236   :  { %1659 = vrcp.f32 %v628_v58 }
 0x23e   :  { %v1656_v33 = vpop.eup %1655 }
 0x23f   :  { %v1658_v34 = vpop.eup %1657  ;;  %v632_v35 = vmul.f32 %v1656_v33, %v1654_v32 }
 0x240   :  { %v631_v36 = vmul.f32 %v1658_v34, %v2116_v31  ;;  %v1660_v38 = vpop.eup %1659  ;;  %v1593_v31 = vld [vmem:[%s2475_s0 + $0x20] sm:$0xff] }
 0x241   :  { %v641_v42 = vunpack.c.l.bf16 %v1593_v31  ;;  %v642_v43 = vunpack.c.h.bf16 %v1593_v31 }
 0x242   :  { %v2163_v37 = vadd.f32 %v632_v35, %v631_v36 }
 0x244   :  { %1661 = vtanh.f32 %v2163_v37 }
 0x24e   :  { %v1662_v39 = vpop.eup %1661 }
 0x24f   :  { %v635_v40 = vmul.f32 %v1662_v39, %v1660_v38 }
 0x251   :  { %1592 = vst [vmem:[%s2479_s4 + $0x8] sm:$0xff] %v635_v40  ;;  %v645_v41 = vpack.c.bf16 %v635_v40, %v635_v40 }
 0x253   :  { %711 = vmatmul.mubr.bf16.vlgmr.msra.gmra.mrb[8].mxu0 %v645_v41  ;;  %752 = vmatmul.mubr.bf16.vlgmr.msra.gmra.mrb[8].mxu1 %v645_v41 }
 0x254   :  { %831 = vmatpush1.bf16.msra.mxu0 %v1977_v61  ;;  %872 = vmatpush1.bf16.msra.mxu1 %v1989_v1 }
 0x255   :  { %832 = vmatprep.subr.bf16.mxu0 %v1979_v62  ;;  %873 = vmatprep.subr.bf16.mxu1 %v1991_v2 }
 0x256   :  { %862 = vmatprep.mubr.bf16.mxu0 %v1761_v59  ;;  %903 = vmatprep.mubr.bf16.mxu1 %v1761_v59 }
 0x258   :  { %833 = vmatpush1.bf16.msra.mxu0 %v1986_v0  ;;  %874 = vmatpush1.bf16.msra.mxu1 %v1997_v4 }
 0x259   :  { %834 = vmatprep.subr.bf16.mxu0 %v1993_v3  ;;  %875 = vmatprep.subr.bf16.mxu1 %v2000_v5 }
 0x25c   :  { %835 = vmatpush1.bf16.msra.mxu0 %v2003_v6  ;;  %876 = vmatpush1.bf16.msra.mxu1 %v2009_v8 }
 0x25d   :  { %836 = vmatprep.subr.bf16.mxu0 %v2005_v7  ;;  %877 = vmatprep.subr.bf16.mxu1 %v2012_v9 }
 0x260   :  { %837 = vmatpush1.bf16.msra.mxu0 %v2015_v10  ;;  %878 = vmatpush1.bf16.msra.mxu1 %v2021_v12 }
 0x261   :  { %838 = vmatprep.subr.bf16.mxu0 %v2017_v11  ;;  %879 = vmatprep.subr.bf16.mxu1 %v2024_v13 }
 0x264   :  { %839 = vmatpush1.bf16.msra.mxu0 %v2027_v14  ;;  %880 = vmatpush1.bf16.msra.mxu1 %v2033_v16 }
 0x265   :  { %840 = vmatprep.subr.bf16.mxu0 %v2029_v15  ;;  %881 = vmatprep.subr.bf16.mxu1 %v2036_v17 }
 0x268   :  { %841 = vmatpush1.bf16.msra.mxu0 %v2039_v18  ;;  %882 = vmatpush1.bf16.msra.mxu1 %v2045_v20 }
 0x269   :  { %842 = vmatprep.subr.bf16.mxu0 %v2041_v19  ;;  %883 = vmatprep.subr.bf16.mxu1 %v2048_v21 }
 0x26c   :  { %843 = vmatpush1.bf16.msra.mxu0 %v2051_v22  ;;  %884 = vmatpush1.bf16.msra.mxu1 %v2057_v24 }
 0x26d   :  { %844 = vmatprep.subr.bf16.mxu0 %v2053_v23  ;;  %885 = vmatprep.subr.bf16.mxu1 %v2060_v25 }
 0x270   :  { %845 = vmatpush1.bf16.msra.mxu0 %v2063_v26  ;;  %886 = vmatpush1.bf16.msra.mxu1 %v2069_v28 }
 0x271   :  { %982 = vmatprep.subr.bf16.mxu0 %v1975_v60  ;;  %1023 = vmatprep.subr.bf16.mxu1 %v1983_v63 }
 0x326   :  { %v712_v44 = vpop.f32.mrb[8].mxu0  ;;  %v753_v45 = vpop.f32.mrb[8].mxu1 }
 0x327   :  { %v760_v46 = vadd.f32 %v712_v44, %v641_v42  ;;  %v714_v48 = vpop.f32.mrb[9].mxu0  ;;  %v755_v49 = vpop.f32.mrb[9].mxu1  ;;  %v762_v29 = vadd.f32 %v753_v45, %v643_v57  ;;  %v2283_v57 = vld [vmem:[#allocation2 + $0x30] sm:$0xff] }
 0x328   :  { %v761_v50 = vadd.f32 %v714_v48, %v642_v43  ;;  %v716_v51 = vpop.f32.mrb[10].mxu0  ;;  %v757_v60 = vpop.f32.mrb[10].mxu1  ;;  %v763_v56 = vadd.f32 %v755_v49, %v644_v55  ;;  %v2277_v55 = vld [vmem:[#allocation2 + $0x38] sm:$0xff] }
 0x329   :  { %v1595_v52 = vmul.f32 -1.442695, %v760_v46  ;;  %v717_v63 = vpop.f32.mrb[11].mxu0  ;;  %v758_v53 = vpop.f32.mrb[11].mxu1  ;;  %v2263_v60 = vld [vmem:[#allocation2 + $0x8] sm:$0xff] }
 0x32a   :  { %v1596_v54 = vmul.f32 -1.442695, %v761_v50  ;;  %v1597_v27 = vmul.f32 -1.442695, %v763_v56  ;;  %v2269_v63 = vld [vmem:[#allocation2] sm:$0xff]  ;;  %v2271_v53 = vld [vmem:[#allocation2 + $0x10] sm:$0xff] }
 0x32b   :  { %1663 = vpow2.f32 %v1595_v52  ;;  %v2265_v52 = vld [vmem:[#allocation2 + $0x18] sm:$0xff]  ;;  %v2281_v56 = vld [vmem:[#allocation2 + $0x20] sm:$0xff] }
 0x32c   :  { %1665 = vpow2.f32 %v1596_v54  ;;  %v2275_v54 = vld [vmem:[#allocation2 + $0x28] sm:$0xff] }
 0x32d   :  { %1667 = vpow2.f32 %v1597_v27  ;;  %v2287_v27 = vld [vmem:[#allocation2 + $0x48] sm:$0xff] }
 0x32e   :  { %1669 = vtanh.f32 %v762_v29  ;;  %v2289_v29 = vld [vmem:[#allocation2 + $0x58] sm:$0xff] }
 0x335   :  { %v1664_v30 = vpop.eup %1663 }
 0x336   :  { %v1666_v32 = vpop.eup %1665  ;;  %v767_v33 = vadd.f32 1.0, %v1664_v30  ;;  %v2293_v30 = vld [vmem:[#allocation2 + $0x40] sm:$0xff] }
 0x337   :  { %v773_v34 = vadd.f32 1.0, %v1666_v32  ;;  %v1668_v35 = vpop.eup %1667  ;;  %v2295_v32 = vld [vmem:[#allocation2 + $0x50] sm:$0xff] }
 0x338   :  { %1671 = vrcp.f32 %v767_v33  ;;  %v1670_v58 = vpop.eup %1669  ;;  %v780_v40 = vadd.f32 1.0, %v1668_v35  ;;  %v2299_v33 = vld [vmem:[#allocation2 + $0x68] sm:$0xff]  ;;  %v2305_v35 = vld [vmem:[#allocation2 + $0x60] sm:$0xff] }
 0x339   :  { %1673 = vrcp.f32 %v773_v34  ;;  %v2301_v34 = vld [vmem:[#allocation2 + $0x78] sm:$0xff] }
 0x33a   :  { %1675 = vrcp.f32 %v780_v40  ;;  %v2319_v40 = vld [vmem:[#allocation2 + $0x90] sm:$0xff] }
 0x342   :  { %v1672_v36 = vpop.eup %1671 }
 0x343   :  { %v1674_v38 = vpop.eup %1673  ;;  %v784_v39 = vmul.f32 %v1672_v36, %v1670_v58  ;;  %v2307_v58 = vld [vmem:[#allocation2 + $0x70] sm:$0xff]  ;;  %v2311_v36 = vld [vmem:[#allocation2 + $0x88] sm:$0xff] }
 0x344   :  { %v783_v41 = vmul.f32 %v1674_v38, %v2163_v37  ;;  %v1676_v42 = vpop.eup %1675  ;;  %v2313_v38 = vld [vmem:[#allocation2 + $0x98] sm:$0xff] }
 0x346   :  { %v2210_v31 = vadd.f32 %v784_v39, %v783_v41  ;;  %v2317_v39 = vld [vmem:[#allocation2 + $0x80] sm:$0xff]  ;;  %v2321_v41 = vld [vmem:[#allocation2 + $0xa8] sm:$0xff] }
 0x348   :  { %1677 = vtanh.f32 %v2210_v31 }
 0x352   :  { %v1678_v43 = vpop.eup %1677 }
 0x353   :  { %v787_v44 = vmul.f32 %v1678_v43, %v1676_v42  ;;  %v2329_v42 = vld [vmem:[#allocation2 + $0xa0] sm:$0xff]  ;;  %v2331_v43 = vld [vmem:[#allocation2 + $0xb0] sm:$0xff] }
 0x355   :  { %1598 = vst [vmem:[%s2479_s4 + $0x10] sm:$0xff] %v787_v44  ;;  %v797_v45 = vpack.c.bf16 %v787_v44, %v787_v44  ;;  %v2333_v44 = vld [vmem:[#allocation2 + $0xc8] sm:$0xff] }
 0x357   :  { %863 = vmatmul.mubr.bf16.vlgmr.msra.gmra.mrb[12].mxu0 %v797_v45  ;;  %904 = vmatmul.mubr.bf16.vlgmr.msra.gmra.mrb[12].mxu1 %v797_v45  ;;  %v2335_v45 = vld [vmem:[#allocation2 + $0xd8] sm:$0xff] }
 0x358   :  { %983 = vmatpush1.bf16.msra.mxu0 %v1977_v61  ;;  %1024 = vmatpush1.bf16.msra.mxu1 %v1989_v1  ;;  %v1599_v61 = vld [vmem:[%s2475_s0 + $0x30] sm:$0xff] }
 0x359   :  { %984 = vmatprep.subr.bf16.mxu0 %v1979_v62  ;;  %1025 = vmatprep.subr.bf16.mxu1 %v1991_v2  ;;  %v793_v62 = vunpack.c.l.bf16 %v1599_v61 }
 0x35a   :  { %1014 = vmatprep.mubr.bf16.mxu0 %v1761_v59  ;;  %1055 = vmatprep.mubr.bf16.mxu1 %v1761_v59 }
 0x35c   :  { %985 = vmatpush1.bf16.msra.mxu0 %v1986_v0  ;;  %1026 = vmatpush1.bf16.msra.mxu1 %v1997_v4  ;;  %v794_v0 = vunpack.c.h.bf16 %v1599_v61  ;;  %v1600_v4 = vld [vmem:[%s2475_s0 + $0x38] sm:$0xff]  ;;  %v2341_v61 = vld [vmem:[#allocation2 + $0xc0] sm:$0xff] }
 0x35d   :  { %986 = vmatprep.subr.bf16.mxu0 %v1993_v3  ;;  %1027 = vmatprep.subr.bf16.mxu1 %v2000_v5 }
 0x360   :  { %987 = vmatpush1.bf16.msra.mxu0 %v2003_v6  ;;  %1028 = vmatpush1.bf16.msra.mxu1 %v2009_v8 }
 0x361   :  { %988 = vmatprep.subr.bf16.mxu0 %v2005_v7  ;;  %1029 = vmatprep.subr.bf16.mxu1 %v2012_v9 }
 0x364   :  { %989 = vmatpush1.bf16.msra.mxu0 %v2015_v10  ;;  %1030 = vmatpush1.bf16.msra.mxu1 %v2021_v12 }
 0x365   :  { %990 = vmatprep.subr.bf16.mxu0 %v2017_v11  ;;  %1031 = vmatprep.subr.bf16.mxu1 %v2024_v13 }
 0x368   :  { %991 = vmatpush1.bf16.msra.mxu0 %v2027_v14  ;;  %1032 = vmatpush1.bf16.msra.mxu1 %v2033_v16  ;;  %v796_v14 = vunpack.c.h.bf16 %v1600_v4  ;;  %v795_v16 = vunpack.c.l.bf16 %v1600_v4  ;;  %v1605_v4 = vld [vmem:[%s2475_s0 + $0x40] sm:$0xff] }
 0x369   :  { %992 = vmatprep.subr.bf16.mxu0 %v2029_v15  ;;  %1033 = vmatprep.subr.bf16.mxu1 %v2036_v17 }
 0x36c   :  { %993 = vmatpush1.bf16.msra.mxu0 %v2039_v18  ;;  %1034 = vmatpush1.bf16.msra.mxu1 %v2045_v20 }
 0x36d   :  { %994 = vmatprep.subr.bf16.mxu0 %v2041_v19  ;;  %1035 = vmatprep.subr.bf16.mxu1 %v2048_v21 }
 0x370   :  { %995 = vmatpush1.bf16.msra.mxu0 %v2051_v22  ;;  %1036 = vmatpush1.bf16.msra.mxu1 %v2057_v24 }
 0x371   :  { %996 = vmatprep.subr.bf16.mxu0 %v2053_v23  ;;  %1037 = vmatprep.subr.bf16.mxu1 %v2060_v25 }
 0x374   :  { %997 = vmatpush1.bf16.msra.mxu0 %v2063_v26  ;;  %1038 = vmatpush1.bf16.msra.mxu1 %v2069_v28 }
 0x375   :  { %1134 = vmatprep.subr.bf16.mxu0 %v2263_v60  ;;  %1175 = vmatprep.subr.bf16.mxu1 %v2265_v52 }
 0x42a   :  { %v864_v1 = vpop.f32.mrb[12].mxu0  ;;  %v905_v2 = vpop.f32.mrb[12].mxu1 }
 0x42b   :  { %v912_v3 = vadd.f32 %v864_v1, %v793_v62  ;;  %v866_v5 = vpop.f32.mrb[13].mxu0  ;;  %v907_v6 = vpop.f32.mrb[13].mxu1  ;;  %v914_v18 = vadd.f32 %v905_v2, %v795_v16  ;;  %v2343_v62 = vld [vmem:[#allocation2 + $0xd0] sm:$0xff]  ;;  %v2347_v1 = vld [vmem:[#allocation2 + $0xf8] sm:$0xff]  ;;  %v2353_v2 = vld [vmem:[#allocation2 + $0xe0] sm:$0xff] }
 0x42c   :  { %v913_v7 = vadd.f32 %v866_v5, %v794_v0  ;;  %v868_v8 = vpop.f32.mrb[14].mxu0  ;;  %v909_v9 = vpop.f32.mrb[14].mxu1  ;;  %v915_v15 = vadd.f32 %v907_v6, %v796_v14  ;;  %v2345_v0 = vld [vmem:[#allocation2 + $0xe8] sm:$0xff]  ;;  %v945_v5 = vunpack.c.l.bf16 %v1605_v4  ;;  %v946_v6 = vunpack.c.h.bf16 %v1605_v4 }
 0x42d   :  { %v1601_v10 = vmul.f32 -1.442695, %v912_v3  ;;  %v869_v11 = vpop.f32.mrb[15].mxu0  ;;  %v910_v12 = vpop.f32.mrb[15].mxu1  ;;  %v2355_v3 = vld [vmem:[#allocation2 + $0xf0] sm:$0xff] }
 0x42e   :  { %v1602_v13 = vmul.f32 -1.442695, %v913_v7  ;;  %v1603_v17 = vmul.f32 -1.442695, %v915_v15 }
 0x42f   :  { %1679 = vpow2.f32 %v1601_v10  ;;  %v1606_v10 = vld [vmem:[%s2475_s0 + $0x48] sm:$0xff] }
 0x430   :  { %1681 = vpow2.f32 %v1602_v13 }
 0x431   :  { %1683 = vpow2.f32 %v1603_v17 }
 0x432   :  { %1685 = vtanh.f32 %v914_v18 }
 0x439   :  { %v1680_v19 = vpop.eup %1679 }
 0x43a   :  { %v1682_v20 = vpop.eup %1681  ;;  %v919_v21 = vadd.f32 1.0, %v1680_v19 }
 0x43b   :  { %v925_v22 = vadd.f32 1.0, %v1682_v20  ;;  %v1684_v23 = vpop.eup %1683  ;;  %v948_v20 = vunpack.c.h.bf16 %v1606_v10 }
 0x43c   :  { %1687 = vrcp.f32 %v919_v21  ;;  %v1686_v24 = vpop.eup %1685  ;;  %v932_v37 = vadd.f32 1.0, %v1684_v23 }
 0x43d   :  { %1689 = vrcp.f32 %v925_v22  ;;  %v947_v22 = vunpack.c.l.bf16 %v1606_v10 }
 0x43e   :  { %1691 = vrcp.f32 %v932_v37 }
 0x446   :  { %v1688_v25 = vpop.eup %1687 }
 0x447   :  { %v1690_v26 = vpop.eup %1689  ;;  %v936_v28 = vmul.f32 %v1688_v25, %v1686_v24 }
 0x448   :  { %v935_v46 = vmul.f32 %v1690_v26, %v2210_v31  ;;  %v1692_v48 = vpop.eup %1691  ;;  %v2325_v31 = vld [vmem:[#allocation2 + $0xb8] sm:$0xff] }
 0x44a   :  { %v2255_v47 = vadd.f32 %v936_v28, %v935_v46 }
 0x44c   :  { %1693 = vtanh.f32 %v2255_v47 }
 0x456   :  { %v1694_v49 = vpop.eup %1693 }
 0x457   :  { %v939_v50 = vmul.f32 %v1694_v49, %v1692_v48 }
 0x459   :  { %1604 = vst [vmem:[%s2479_s4 + $0x18] sm:$0xff] %v939_v50  ;;  %v949_v51 = vpack.c.bf16 %v939_v50, %v939_v50 }
 0x45b   :  { %1015 = vmatmul.mubr.bf16.vlgmr.msra.gmra.mrb[16].mxu0 %v949_v51  ;;  %1056 = vmatmul.mubr.bf16.vlgmr.msra.gmra.mrb[16].mxu1 %v949_v51 }
 0x45c   :  { %1166 = vmatprep.mubr.bf16.mxu0 %v1761_v59  ;;  %1207 = vmatprep.mubr.bf16.mxu1 %v1761_v59 }
 0x45d   :  { %1135 = vmatpush1.bf16.msra.mxu0 %v2269_v63  ;;  %1176 = vmatpush1.bf16.msra.mxu1 %v2271_v53 }
 0x45e   :  { %1136 = vmatprep.subr.bf16.mxu0 %v2275_v54  ;;  %1177 = vmatprep.subr.bf16.mxu1 %v2277_v55 }
 0x461   :  { %1137 = vmatpush1.bf16.msra.mxu0 %v2281_v56  ;;  %1178 = vmatpush1.bf16.msra.mxu1 %v2283_v57 }
 0x462   :  { %1138 = vmatprep.subr.bf16.mxu0 %v2287_v27  ;;  %1179 = vmatprep.subr.bf16.mxu1 %v2289_v29 }
 0x465   :  { %1139 = vmatpush1.bf16.msra.mxu0 %v2293_v30  ;;  %1180 = vmatpush1.bf16.msra.mxu1 %v2295_v32 }
 0x466   :  { %1140 = vmatprep.subr.bf16.mxu0 %v2299_v33  ;;  %1181 = vmatprep.subr.bf16.mxu1 %v2301_v34 }
 0x469   :  { %1141 = vmatpush1.bf16.msra.mxu0 %v2305_v35  ;;  %1182 = vmatpush1.bf16.msra.mxu1 %v2307_v58 }
 0x46a   :  { %1142 = vmatprep.subr.bf16.mxu0 %v2311_v36  ;;  %1183 = vmatprep.subr.bf16.mxu1 %v2313_v38 }
 0x46d   :  { %1143 = vmatpush1.bf16.msra.mxu0 %v2317_v39  ;;  %1184 = vmatpush1.bf16.msra.mxu1 %v2319_v40 }
 0x46e   :  { %1144 = vmatprep.subr.bf16.mxu0 %v2321_v41  ;;  %1185 = vmatprep.subr.bf16.mxu1 %v2325_v31 }
 0x471   :  { %1145 = vmatpush1.bf16.msra.mxu0 %v2329_v42  ;;  %1186 = vmatpush1.bf16.msra.mxu1 %v2331_v43 }
 0x472   :  { %1146 = vmatprep.subr.bf16.mxu0 %v2333_v44  ;;  %1187 = vmatprep.subr.bf16.mxu1 %v2335_v45 }
 0x475   :  { %1147 = vmatpush1.bf16.msra.mxu0 %v2341_v61  ;;  %1188 = vmatpush1.bf16.msra.mxu1 %v2343_v62 }
 0x476   :  { %1148 = vmatprep.subr.bf16.mxu0 %v2345_v0  ;;  %1189 = vmatprep.subr.bf16.mxu1 %v2347_v1 }
 0x479   :  { %1149 = vmatpush1.bf16.msra.mxu0 %v2353_v2  ;;  %1190 = vmatpush1.bf16.msra.mxu1 %v2355_v3 }
 0x47a   :  { %1286 = vmatprep.subr.bf16.mxu0 %v2263_v60  ;;  %1327 = vmatprep.subr.bf16.mxu1 %v2265_v52 }
 0x52e   :  { %v1016_v7 = vpop.f32.mrb[16].mxu0  ;;  %v1057_v8 = vpop.f32.mrb[16].mxu1 }
 0x52f   :  { %v1064_v9 = vadd.f32 %v1016_v7, %v945_v5  ;;  %v1018_v11 = vpop.f32.mrb[17].mxu0  ;;  %v1059_v12 = vpop.f32.mrb[17].mxu1  ;;  %v1066_v24 = vadd.f32 %v1057_v8, %v947_v22 }
 0x530   :  { %v1065_v13 = vadd.f32 %v1018_v11, %v946_v6  ;;  %v1020_v14 = vpop.f32.mrb[18].mxu0  ;;  %v1061_v15 = vpop.f32.mrb[18].mxu1  ;;  %v1067_v21 = vadd.f32 %v1059_v12, %v948_v20 }
 0x531   :  { %v1607_v16 = vmul.f32 -1.442695, %v1064_v9  ;;  %v1021_v17 = vpop.f32.mrb[19].mxu0  ;;  %v1062_v18 = vpop.f32.mrb[19].mxu1 }
 0x532   :  { %v1608_v19 = vmul.f32 -1.442695, %v1065_v13  ;;  %v1609_v23 = vmul.f32 -1.442695, %v1067_v21 }
 0x533   :  { %1695 = vpow2.f32 %v1607_v16  ;;  %v1612_v16 = vld [vmem:[%s2475_s0 + $0x58] sm:$0xff] }
 0x534   :  { %1697 = vpow2.f32 %v1608_v19 }
 0x535   :  { %1699 = vpow2.f32 %v1609_v23 }
 0x536   :  { %1701 = vtanh.f32 %v1066_v24  ;;  %v1100_v24 = vunpack.c.h.bf16 %v1612_v16 }
 0x53d   :  { %v1696_v25 = vpop.eup %1695 }
 0x53e   :  { %v1698_v26 = vpop.eup %1697  ;;  %v1071_v28 = vadd.f32 1.0, %v1696_v25 }
 0x53f   :  { %v1077_v37 = vadd.f32 1.0, %v1698_v26  ;;  %v1700_v46 = vpop.eup %1699  ;;  %v1099_v26 = vunpack.c.l.bf16 %v1612_v16 }
 0x540   :  { %1703 = vrcp.f32 %v1071_v28  ;;  %v1702_v48 = vpop.eup %1701  ;;  %v1084_v4 = vadd.f32 1.0, %v1700_v46 }
 0x541   :  { %1705 = vrcp.f32 %v1077_v37 }
 0x542   :  { %1707 = vrcp.f32 %v1084_v4 }
 0x54a   :  { %v1704_v49 = vpop.eup %1703 }
 0x54b   :  { %v1706_v50 = vpop.eup %1705  ;;  %v1088_v51 = vmul.f32 %v1704_v49, %v1702_v48 }
 0x54c   :  { %v1087_v5 = vmul.f32 %v1706_v50, %v2255_v47  ;;  %v1708_v7 = vpop.eup %1707  ;;  %v1611_v47 = vld [vmem:[%s2475_s0 + $0x50] sm:$0xff] }
 0x54d   :  { %v1097_v11 = vunpack.c.l.bf16 %v1611_v47  ;;  %v1098_v12 = vunpack.c.h.bf16 %v1611_v47 }
 0x54e   :  { %v2368_v6 = vadd.f32 %v1088_v51, %v1087_v5 }
 0x550   :  { %1709 = vtanh.f32 %v2368_v6 }
 0x55a   :  { %v1710_v8 = vpop.eup %1709 }
 0x55b   :  { %v1091_v9 = vmul.f32 %v1710_v8, %v1708_v7 }
 0x55d   :  { %1610 = vst [vmem:[%s2479_s4 + $0x20] sm:$0xff] %v1091_v9  ;;  %v1101_v10 = vpack.c.bf16 %v1091_v9, %v1091_v9 }
 0x55f   :  { %1167 = vmatmul.mubr.bf16.vlgmr.msra.gmra.mrb[20].mxu0 %v1101_v10  ;;  %1208 = vmatmul.mubr.bf16.vlgmr.msra.gmra.mrb[20].mxu1 %v1101_v10 }
 0x560   :  { %1287 = vmatpush1.bf16.msra.mxu0 %v2269_v63  ;;  %1328 = vmatpush1.bf16.msra.mxu1 %v2271_v53 }
 0x561   :  { %1288 = vmatprep.subr.bf16.mxu0 %v2275_v54  ;;  %1329 = vmatprep.subr.bf16.mxu1 %v2277_v55 }
 0x562   :  { %1318 = vmatprep.mubr.bf16.mxu0 %v1761_v59  ;;  %1359 = vmatprep.mubr.bf16.mxu1 %v1761_v59 }
 0x564   :  { %1289 = vmatpush1.bf16.msra.mxu0 %v2281_v56  ;;  %1330 = vmatpush1.bf16.msra.mxu1 %v2283_v57 }
 0x565   :  { %1290 = vmatprep.subr.bf16.mxu0 %v2287_v27  ;;  %1331 = vmatprep.subr.bf16.mxu1 %v2289_v29 }
 0x568   :  { %1291 = vmatpush1.bf16.msra.mxu0 %v2293_v30  ;;  %1332 = vmatpush1.bf16.msra.mxu1 %v2295_v32 }
 0x569   :  { %1292 = vmatprep.subr.bf16.mxu0 %v2299_v33  ;;  %1333 = vmatprep.subr.bf16.mxu1 %v2301_v34 }
 0x56c   :  { %1293 = vmatpush1.bf16.msra.mxu0 %v2305_v35  ;;  %1334 = vmatpush1.bf16.msra.mxu1 %v2307_v58 }
 0x56d   :  { %1294 = vmatprep.subr.bf16.mxu0 %v2311_v36  ;;  %1335 = vmatprep.subr.bf16.mxu1 %v2313_v38 }
 0x570   :  { %1295 = vmatpush1.bf16.msra.mxu0 %v2317_v39  ;;  %1336 = vmatpush1.bf16.msra.mxu1 %v2319_v40 }
 0x571   :  { %1296 = vmatprep.subr.bf16.mxu0 %v2321_v41  ;;  %1337 = vmatprep.subr.bf16.mxu1 %v2325_v31 }
 0x574   :  { %1297 = vmatpush1.bf16.msra.mxu0 %v2329_v42  ;;  %1338 = vmatpush1.bf16.msra.mxu1 %v2331_v43 }
 0x575   :  { %1298 = vmatprep.subr.bf16.mxu0 %v2333_v44  ;;  %1339 = vmatprep.subr.bf16.mxu1 %v2335_v45 }
 0x578   :  { %1299 = vmatpush1.bf16.msra.mxu0 %v2341_v61  ;;  %1340 = vmatpush1.bf16.msra.mxu1 %v2343_v62 }
 0x579   :  { %1300 = vmatprep.subr.bf16.mxu0 %v2345_v0  ;;  %1341 = vmatprep.subr.bf16.mxu1 %v2347_v1 }
 0x57c   :  { %1301 = vmatpush1.bf16.msra.mxu0 %v2353_v2  ;;  %1342 = vmatpush1.bf16.msra.mxu1 %v2355_v3 }
 0x57d   :  { %1438 = vmatprep.subr.bf16.mxu0 %v2263_v60  ;;  %1479 = vmatprep.subr.bf16.mxu1 %v2265_v52 }
 0x632   :  { %v1168_v13 = vpop.f32.mrb[20].mxu0  ;;  %v1209_v14 = vpop.f32.mrb[20].mxu1 }
 0x633   :  { %v1216_v15 = vadd.f32 %v1168_v13, %v1097_v11  ;;  %v1170_v17 = vpop.f32.mrb[21].mxu0  ;;  %v1211_v18 = vpop.f32.mrb[21].mxu1  ;;  %v1218_v37 = vadd.f32 %v1209_v14, %v1099_v26 }
 0x634   :  { %v1217_v19 = vadd.f32 %v1170_v17, %v1098_v12  ;;  %v1172_v20 = vpop.f32.mrb[22].mxu0  ;;  %v1213_v60 = vpop.f32.mrb[22].mxu1  ;;  %v1219_v25 = vadd.f32 %v1211_v18, %v1100_v24  ;;  %v1624_v24 = vld [vmem:[%s2475_s0 + $0x78] sm:$0xff] }
 0x635   :  { %v1613_v21 = vmul.f32 -1.442695, %v1216_v15  ;;  %v1173_v52 = vpop.f32.mrb[23].mxu0  ;;  %v1214_v22 = vpop.f32.mrb[23].mxu1  ;;  %v1623_v20 = vld [vmem:[%s2475_s0 + $0x70] sm:$0xff] }
 0x636   :  { %v1614_v23 = vmul.f32 -1.442695, %v1217_v19  ;;  %v1615_v28 = vmul.f32 -1.442695, %v1219_v25  ;;  %v1401_v60 = vunpack.c.l.bf16 %v1623_v20 }
 0x637   :  { %1711 = vpow2.f32 %v1613_v21  ;;  %v1402_v21 = vunpack.c.h.bf16 %v1623_v20 }
 0x638   :  { %1713 = vpow2.f32 %v1614_v23 }
 0x639   :  { %1715 = vpow2.f32 %v1615_v28 }
 0x63a   :  { %1717 = vtanh.f32 %v1218_v37 }
 0x641   :  { %v1712_v46 = vpop.eup %1711 }
 0x642   :  { %v1714_v48 = vpop.eup %1713  ;;  %v1223_v49 = vadd.f32 1.0, %v1712_v46 }
 0x643   :  { %v1229_v50 = vadd.f32 1.0, %v1714_v48  ;;  %v1716_v51 = vpop.eup %1715 }
 0x644   :  { %1719 = vrcp.f32 %v1223_v49  ;;  %v1718_v4 = vpop.eup %1717  ;;  %v1236_v9 = vadd.f32 1.0, %v1716_v51 }
 0x645   :  { %1721 = vrcp.f32 %v1229_v50 }
 0x646   :  { %1723 = vrcp.f32 %v1236_v9 }
 0x64e   :  { %v1720_v5 = vpop.eup %1719 }
 0x64f   :  { %v1722_v7 = vpop.eup %1721  ;;  %v1240_v8 = vmul.f32 %v1720_v5, %v1718_v4  ;;  %v1404_v4 = vunpack.c.h.bf16 %v1624_v24 }
 0x650   :  { %v1239_v10 = vmul.f32 %v1722_v7, %v2368_v6  ;;  %v1724_v11 = vpop.eup %1723  ;;  %v1403_v7 = vunpack.c.l.bf16 %v1624_v24 }
 0x652   :  { %v2415_v47 = vadd.f32 %v1240_v8, %v1239_v10 }
 0x654   :  { %1725 = vtanh.f32 %v2415_v47 }
 0x65e   :  { %v1726_v12 = vpop.eup %1725 }
 0x65f   :  { %v1243_v13 = vmul.f32 %v1726_v12, %v1724_v11 }
 0x661   :  { %1616 = vst [vmem:[%s2479_s4 + $0x28] sm:$0xff] %v1243_v13  ;;  %v1253_v14 = vpack.c.bf16 %v1243_v13, %v1243_v13 }
 0x663   :  { %1319 = vmatmul.mubr.bf16.vlgmr.msra.gmra.mrb[24].mxu0 %v1253_v14  ;;  %1360 = vmatmul.mubr.bf16.vlgmr.msra.gmra.mrb[24].mxu1 %v1253_v14 }
 0x664   :  { %1439 = vmatpush1.bf16.msra.mxu0 %v2269_v63  ;;  %1480 = vmatpush1.bf16.msra.mxu1 %v2271_v53 }
 0x665   :  { %1440 = vmatprep.subr.bf16.mxu0 %v2275_v54  ;;  %1481 = vmatprep.subr.bf16.mxu1 %v2277_v55 }
 0x666   :  { %1470 = vmatprep.mubr.bf16.mxu0 %v1761_v59  ;;  %1511 = vmatprep.mubr.bf16.mxu1 %v1761_v59  ;;  %v1617_v59 = vld [vmem:[%s2475_s0 + $0x60] sm:$0xff] }
 0x667   :  { %v1249_v63 = vunpack.c.l.bf16 %v1617_v59  ;;  %v1250_v53 = vunpack.c.h.bf16 %v1617_v59 }
 0x668   :  { %1441 = vmatpush1.bf16.msra.mxu0 %v2281_v56  ;;  %1482 = vmatpush1.bf16.msra.mxu1 %v2283_v57  ;;  %v1618_v57 = vld [vmem:[%s2475_s0 + $0x68] sm:$0xff] }
 0x669   :  { %1442 = vmatprep.subr.bf16.mxu0 %v2287_v27  ;;  %1483 = vmatprep.subr.bf16.mxu1 %v2289_v29 }
 0x66c   :  { %1443 = vmatpush1.bf16.msra.mxu0 %v2293_v30  ;;  %1484 = vmatpush1.bf16.msra.mxu1 %v2295_v32 }
 0x66d   :  { %1444 = vmatprep.subr.bf16.mxu0 %v2299_v33  ;;  %1485 = vmatprep.subr.bf16.mxu1 %v2301_v34 }
 0x670   :  { %1445 = vmatpush1.bf16.msra.mxu0 %v2305_v35  ;;  %1486 = vmatpush1.bf16.msra.mxu1 %v2307_v58 }
 0x671   :  { %1446 = vmatprep.subr.bf16.mxu0 %v2311_v36  ;;  %1487 = vmatprep.subr.bf16.mxu1 %v2313_v38  ;;  %v1252_v38 = vunpack.c.h.bf16 %v1618_v57 }
 0x674   :  { %1447 = vmatpush1.bf16.msra.mxu0 %v2317_v39  ;;  %1488 = vmatpush1.bf16.msra.mxu1 %v2319_v40  ;;  %v1251_v40 = vunpack.c.l.bf16 %v1618_v57 }
 0x675   :  { %1448 = vmatprep.subr.bf16.mxu0 %v2321_v41  ;;  %1489 = vmatprep.subr.bf16.mxu1 %v2325_v31 }
 0x678   :  { %1449 = vmatpush1.bf16.msra.mxu0 %v2329_v42  ;;  %1490 = vmatpush1.bf16.msra.mxu1 %v2331_v43 }
 0x679   :  { %1450 = vmatprep.subr.bf16.mxu0 %v2333_v44  ;;  %1491 = vmatprep.subr.bf16.mxu1 %v2335_v45 }
 0x67c   :  { %1451 = vmatpush1.bf16.msra.mxu0 %v2341_v61  ;;  %1492 = vmatpush1.bf16.msra.mxu1 %v2343_v62 }
 0x67d   :  { %1452 = vmatprep.subr.bf16.mxu0 %v2345_v0  ;;  %1493 = vmatprep.subr.bf16.mxu1 %v2347_v1 }
 0x680   :  { %1453 = vmatpush1.bf16.msra.mxu0 %v2353_v2  ;;  %1494 = vmatpush1.bf16.msra.mxu1 %v2355_v3 }
 0x736   :  { %v1320_v54 = vpop.f32.mrb[24].mxu0  ;;  %v1361_v55 = vpop.f32.mrb[24].mxu1 }
 0x737   :  { %v1368_v56 = vadd.f32 %v1320_v54, %v1249_v63  ;;  %v1322_v27 = vpop.f32.mrb[25].mxu0  ;;  %v1363_v29 = vpop.f32.mrb[25].mxu1  ;;  %v1370_v31 = vadd.f32 %v1361_v55, %v1251_v40 }
 0x738   :  { %v1369_v30 = vadd.f32 %v1322_v27, %v1250_v53  ;;  %v1324_v32 = vpop.f32.mrb[26].mxu0  ;;  %v1365_v33 = vpop.f32.mrb[26].mxu1  ;;  %v1371_v39 = vadd.f32 %v1363_v29, %v1252_v38 }
 0x739   :  { %v1619_v34 = vmul.f32 -1.442695, %v1368_v56  ;;  %v1325_v35 = vpop.f32.mrb[27].mxu0  ;;  %v1366_v58 = vpop.f32.mrb[27].mxu1 }
 0x73a   :  { %v1620_v36 = vmul.f32 -1.442695, %v1369_v30  ;;  %v1621_v41 = vmul.f32 -1.442695, %v1371_v39 }
 0x73b   :  { %1727 = vpow2.f32 %v1619_v34 }
 0x73c   :  { %1729 = vpow2.f32 %v1620_v36 }
 0x73d   :  { %1731 = vpow2.f32 %v1621_v41 }
 0x73e   :  { %1733 = vtanh.f32 %v1370_v31 }
 0x745   :  { %v1728_v42 = vpop.eup %1727 }
 0x746   :  { %v1730_v43 = vpop.eup %1729  ;;  %v1375_v44 = vadd.f32 1.0, %v1728_v42 }
 0x747   :  { %v1381_v45 = vadd.f32 1.0, %v1730_v43  ;;  %v1732_v61 = vpop.eup %1731 }
 0x748   :  { %1735 = vrcp.f32 %v1375_v44  ;;  %v1734_v62 = vpop.eup %1733  ;;  %v1388_v3 = vadd.f32 1.0, %v1732_v61 }
 0x749   :  { %1737 = vrcp.f32 %v1381_v45 }
 0x74a   :  { %1739 = vrcp.f32 %v1388_v3 }
 0x752   :  { %v1736_v0 = vpop.eup %1735 }
 0x753   :  { %v1738_v1 = vpop.eup %1737  ;;  %v1392_v2 = vmul.f32 %v1736_v0, %v1734_v62 }
 0x754   :  { %v1391_v6 = vmul.f32 %v1738_v1, %v2415_v47  ;;  %v1740_v16 = vpop.eup %1739 }
 0x756   :  { %v1393_v15 = vadd.f32 %v1392_v2, %v1391_v6 }
 0x758   :  { %1741 = vtanh.f32 %v1393_v15 }
 0x762   :  { %v1742_v17 = vpop.eup %1741 }
 0x763   :  { %v1395_v18 = vmul.f32 %v1742_v17, %v1740_v16 }
 0x765   :  { %1622 = vst [vmem:[%s2479_s4 + $0x30] sm:$0xff] %v1395_v18  ;;  %v1405_v19 = vpack.c.bf16 %v1395_v18, %v1395_v18 }
 0x767   :  { %1471 = vmatmul.mubr.bf16.vlgmr.msra.gmra.mrb[28].mxu0 %v1405_v19  ;;  %1512 = vmatmul.mubr.bf16.vlgmr.msra.gmra.mrb[28].mxu1 %v1405_v19 }
 0x83a   :  { %v1472_v52 = vpop.f32.mrb[28].mxu0  ;;  %v1513_v22 = vpop.f32.mrb[28].mxu1 }
 0x83b   :  { %v1520_v23 = vadd.f32 %v1472_v52, %v1401_v60  ;;  %v1474_v25 = vpop.f32.mrb[29].mxu0  ;;  %v1515_v26 = vpop.f32.mrb[29].mxu1  ;;  %v1522_v9 = vadd.f32 %v1513_v22, %v1403_v7 }
 0x83c   :  { %v1521_v28 = vadd.f32 %v1474_v25, %v1402_v21  ;;  %v1476_v37 = vpop.f32.mrb[30].mxu0  ;;  %v1517_v46 = vpop.f32.mrb[30].mxu1  ;;  %v1523_v5 = vadd.f32 %v1515_v26, %v1404_v4 }
 0x83d   :  { %v1625_v48 = vmul.f32 -1.442695, %v1520_v23  ;;  %v1477_v49 = vpop.f32.mrb[31].mxu0  ;;  %v1518_v50 = vpop.f32.mrb[31].mxu1 }
 0x83e   :  { %v1626_v51 = vmul.f32 -1.442695, %v1521_v28  ;;  %v1627_v8 = vmul.f32 -1.442695, %v1523_v5 }
 0x83f   :  { %1743 = vpow2.f32 %v1625_v48 }
 0x840   :  { %1745 = vpow2.f32 %v1626_v51 }
 0x841   :  { %1747 = vpow2.f32 %v1627_v8 }
 0x842   :  { %1749 = vtanh.f32 %v1522_v9 }
 0x849   :  { %v1744_v10 = vpop.eup %1743 }
 0x84a   :  { %v1746_v47 = vpop.eup %1745  ;;  %v1527_v11 = vadd.f32 1.0, %v1744_v10 }
 0x84b   :  { %v1533_v12 = vadd.f32 1.0, %v1746_v47  ;;  %v1748_v13 = vpop.eup %1747 }
 0x84c   :  { %1751 = vrcp.f32 %v1527_v11  ;;  %v1750_v14 = vpop.eup %1749  ;;  %v1540_v54 = vadd.f32 1.0, %v1748_v13 }
 0x84d   :  { %1753 = vrcp.f32 %v1533_v12 }
 0x84e   :  { %1755 = vrcp.f32 %v1540_v54 }
 0x856   :  { %v1752_v59 = vpop.eup %1751 }
 0x857   :  { %v1754_v63 = vpop.eup %1753  ;;  %v1544_v53 = vmul.f32 %v1752_v59, %v1750_v14 }
 0x858   :  { %v1543_v55 = vmul.f32 %v1754_v63, %v1393_v15  ;;  %v1756_v57 = vpop.eup %1755 }
 0x85a   :  { %v1545_v56 = vadd.f32 %v1544_v53, %v1543_v55 }
 0x85c   :  { %1757 = vtanh.f32 %v1545_v56  ;;  %1555 = vst [vmem:[%s2480_s5] sm:$0xff] %v1545_v56 }
 0x866   :  { %v1758_v27 = vpop.eup %1757 }
 0x867   :  { %v1547_v29 = vmul.f32 %v1758_v27, %v1756_v57 }
 0x869   :  { %1628 = vst [vmem:[%s2479_s4 + $0x38] sm:$0xff] %v1547_v29 }
 0x86a   :  { %1564 = vsyncmov [#allocation5] }
 0x86d   :  { %s1565_s29 = vpop.sfrf %1564 }
 0x86e   :  { %p1629_p0 = scmp.ne.s32.totalorder %s1565_s29, 0 }
 0x870   :  { %1569 = shalt.err (%p1629_p0)  }

</bundles_post_ra>
